<compile_context>
chip_gen: v7x
topology: tpu7x:2x2x1
jax: 0.10.0
libtpu: 0.0.40
codegen_flags: <defaults>
</compile_context>

<pallas_src>
import math
import functools

import jax
import jax.numpy as jnp
from jax import lax
from jax.experimental import pallas as pl
from jax.experimental.pallas import tpu as pltpu


# ------------------------------ Pallas kernel --------------------------------
def _sdpa_kernel(q_ref, k_ref, v_ref, bias_ref, ctx_ref, attn_ref, *, inv_scale):
    """One batch element: all heads fused.

    q_ref/k_ref/v_ref : (1, H, S, dk)  bf16
    bias_ref          : (1, S, S)      f32 additive mask (0 or -1e9)
    ctx_ref           : (1, S, H*dk)   f32 (lane-dense output)
    attn_ref          : (1, H, S, S)   f32
    """
    q = q_ref[0]                      # (H, S, dk)
    k = k_ref[0]                      # (H, S, dk)
    v = v_ref[0]                      # (H, S, dk)
    bias = bias_ref[0]                # (S, S)
    H = q.shape[0]

    # scores = Q @ K^T : contract d_k directly (no transpose of K materialized),
    # batched over the head axis, accumulated in f32 on the MXU.
    scores = lax.dot_general(
        q, k,
        dimension_numbers=(((2,), (2,)), ((0,), (0,))),
        preferred_element_type=jnp.float32)            # (H, S, S)
    scores = scores * inv_scale + bias[None, :, :]

    # Numerically-stable softmax over keys, stats kept in f32.
    m = jnp.max(scores, axis=-1, keepdims=True)
    p = jnp.exp(scores - m)
    denom = jnp.sum(p, axis=-1, keepdims=True)
    attn = p * pl.reciprocal(denom, approx=True)       # (H, S, S) f32
    attn_ref[0] = attn

    # context = attn @ V, per head (static unroll), concatenated along lanes so
    # the output block is a single dense (S, H*dk) slab.
    p_lo = attn.astype(v.dtype)                        # bf16 for the MXU
    ctx_heads = [
        jnp.dot(p_lo[h], v[h], preferred_element_type=jnp.float32)  # (S, dk)
        for h in range(H)
    ]
    ctx_ref[0] = jnp.concatenate(ctx_heads, axis=-1)   # (S, H*dk)


# --------------------------------- wrapper ------------------------------------
def scaled_dot_product_attention(Q, K, V, attn_mask):
    """Q, K, V: (B, H, S, dk) float32.  attn_mask: (B, S, S) bool (True = mask),
    broadcast over heads (BERT pad-mask convention).  Returns (context, attn)
    with context (B, H, S, dk) f32 and attn (B, H, S, S) f32."""
    B, H, S, dk = Q.shape
    inv_scale = 1.0 / math.sqrt(dk)

    # Fold the boolean mask into an additive bias once, outside the kernel.
    bias = attn_mask.astype(jnp.float32) * jnp.float32(-1e9)        # (B, S, S)

    # bf16 operands, f32 accumulation inside the kernel.
    q = Q.astype(jnp.bfloat16)
    k = K.astype(jnp.bfloat16)
    v = V.astype(jnp.bfloat16)

    kernel = functools.partial(_sdpa_kernel, inv_scale=inv_scale)
    ctx_dense, attn = pl.pallas_call(
        kernel,
        out_shape=(
            jax.ShapeDtypeStruct((B, S, H * dk), jnp.float32),
            jax.ShapeDtypeStruct((B, H, S, S), jnp.float32),
        ),
        grid=(B,),
        in_specs=[
            pl.BlockSpec((1, H, S, dk), lambda b: (b, 0, 0, 0)),
            pl.BlockSpec((1, H, S, dk), lambda b: (b, 0, 0, 0)),
            pl.BlockSpec((1, H, S, dk), lambda b: (b, 0, 0, 0)),
            pl.BlockSpec((1, S, S),     lambda b: (b, 0, 0)),
        ],
        out_specs=[
            pl.BlockSpec((1, S, H * dk), lambda b: (b, 0, 0)),
            pl.BlockSpec((1, H, S, S),   lambda b: (b, 0, 0, 0)),
        ],
        compiler_params=pltpu.CompilerParams(
            dimension_semantics=("parallel",)),
    )(q, k, v, bias)

    # Layout plumbing back to the PyTorch (B, H, S, dk) contract.
    context = ctx_dense.reshape(B, S, H, dk).transpose(0, 2, 1, 3)
    return context, attn
    # Note: for long sequences / big models this whole-(S,S) block would be
    # replaced by a flash-style streamed kernel tiled over query/key blocks.


# ----------------------------- plain-JAX reference ----------------------------
def sdpa_reference(Q, K, V, attn_mask):
    dk = Q.shape[-1]
    scores = jnp.einsum("bhqd,bhkd->bhqk", Q, K) / math.sqrt(dk)
    scores = jnp.where(attn_mask[:, None, :, :], jnp.float32(-1e9), scores)
    attn = jax.nn.softmax(scores, axis=-1)
    context = jnp.einsum("bhqk,bhkd->bhqd", attn, V)
    return context, attn


# ------------------------------------ main ------------------------------------
if __name__ == "__main__":
    B, H, S, DK = 2, 4, 128, 64        # d_k = d_v = 64 as in the spec

    root = jax.random.PRNGKey(0)
    kq, kk, kv = jax.random.split(root, 3)
    Q = jax.random.normal(kq, (B, H, S, DK), dtype=jnp.float32)
    K = jax.random.normal(kk, (B, H, S, DK), dtype=jnp.float32)
    V = jax.random.normal(kv, (B, H, S, DK), dtype=jnp.float32)

    # Key-padding style mask: the last 16 key positions are padding -> masked
    # for every query (broadcast over heads, like BERT's get_attn_pad_mask).
    key_is_pad = jnp.arange(S) >= (S - 16)                       # (S,)
    attn_mask = jnp.broadcast_to(key_is_pad[None, None, :], (B, S, S))

    context, attn = jax.jit(scaled_dot_product_attention)(Q, K, V, attn_mask)
    jax.block_until_ready((context, attn))

    # Correctness vs the PyTorch-equivalent f32 reference (bf16 MXU operands
    # with f32 accumulation -> loose-ish tolerance).
    ref_ctx, ref_attn = sdpa_reference(Q, K, V, attn_mask)
    assert context.shape == (B, H, S, DK)
    assert attn.shape == (B, H, S, S)
    assert jnp.all(jnp.isfinite(context)) and jnp.all(jnp.isfinite(attn))
    assert jnp.allclose(attn, ref_attn, atol=3e-2, rtol=3e-2)
    assert jnp.allclose(context, ref_ctx, atol=3e-2, rtol=3e-2)

    print("KERNEL_OK")
</pallas_src>

<mosaic_0001>
module attributes {stable_mosaic.version = 11 : i64} {
  func.func @_sdpa_kernel(%arg0: i32, %arg1: memref<1x4x128x64xbf16, #tpu.memory_space<vmem>>, %arg2: memref<1x4x128x64xbf16, #tpu.memory_space<vmem>>, %arg3: memref<1x4x128x64xbf16, #tpu.memory_space<vmem>>, %arg4: memref<1x128x128xf32, #tpu.memory_space<vmem>>, %arg5: memref<1x128x256xf32, #tpu.memory_space<vmem>>, %arg6: memref<1x4x128x128xf32, #tpu.memory_space<vmem>>) attributes {dimension_semantics = [#tpu.dimension_semantics<parallel>], iteration_bounds = array<i64: 2>, scalar_prefetch = 0 : i64, scratch_operands = 0 : i64, tpu.core_type = #tpu.core_type<tc>, window_params = [{transform_indices = @transform_0, window_bounds = array<i64: 1, 4, 128, 64>}, {transform_indices = @transform_1, window_bounds = array<i64: 1, 4, 128, 64>}, {transform_indices = @transform_2, window_bounds = array<i64: 1, 4, 128, 64>}, {transform_indices = @transform_3, window_bounds = array<i64: 1, 128, 128>}, {transform_indices = @transform_4, window_bounds = array<i64: 1, 128, 256>}, {transform_indices = @transform_5, window_bounds = array<i64: 1, 4, 128, 128>}]} {
    %c0 = arith.constant 0 : index
    %c0_0 = arith.constant 0 : index
    %c0_1 = arith.constant 0 : index
    %c0_2 = arith.constant 0 : index
    %0 = vector.load %arg1[%c0, %c0_0, %c0_1, %c0_2] : memref<1x4x128x64xbf16, #tpu.memory_space<vmem>>, vector<1x4x128x64xbf16>
    %1 = vector.shape_cast %0 : vector<1x4x128x64xbf16> to vector<4x128x64xbf16>
    %c0_3 = arith.constant 0 : index
    %c0_4 = arith.constant 0 : index
    %c0_5 = arith.constant 0 : index
    %c0_6 = arith.constant 0 : index
    %2 = vector.load %arg2[%c0_3, %c0_4, %c0_5, %c0_6] : memref<1x4x128x64xbf16, #tpu.memory_space<vmem>>, vector<1x4x128x64xbf16>
    %3 = vector.shape_cast %2 : vector<1x4x128x64xbf16> to vector<4x128x64xbf16>
    %c0_7 = arith.constant 0 : index
    %c0_8 = arith.constant 0 : index
    %c0_9 = arith.constant 0 : index
    %c0_10 = arith.constant 0 : index
    %4 = vector.load %arg3[%c0_7, %c0_8, %c0_9, %c0_10] : memref<1x4x128x64xbf16, #tpu.memory_space<vmem>>, vector<1x4x128x64xbf16>
    %5 = vector.shape_cast %4 : vector<1x4x128x64xbf16> to vector<4x128x64xbf16>
    %c0_11 = arith.constant 0 : index
    %c0_12 = arith.constant 0 : index
    %c0_13 = arith.constant 0 : index
    %6 = vector.load %arg4[%c0_11, %c0_12, %c0_13] : memref<1x128x128xf32, #tpu.memory_space<vmem>>, vector<1x128x128xf32>
    %7 = vector.shape_cast %6 : vector<1x128x128xf32> to vector<128x128xf32>
    %cst = arith.constant dense<0.000000e+00> : vector<4x128x128xf32>
    %8 = tpu.matmul %1, %3, %cst {dimension_numbers = #tpu.dot_dimension_numbers<[2], [2], [1], [1], [0, 0, 0, 1, 1, 1], [0], [0]>} : vector<4x128x64xbf16>, vector<4x128x64xbf16>, vector<4x128x128xf32> -> vector<4x128x128xf32>
    %cst_14 = arith.constant 1.250000e-01 : f32
    %9 = vector.broadcast %cst_14 : f32 to vector<4x128x128xf32>
    %10 = arith.mulf %8, %9 : vector<4x128x128xf32>
    %11 = vector.shape_cast %7 : vector<128x128xf32> to vector<1x128x128xf32>
    %12 = vector.broadcast %11 : vector<1x128x128xf32> to vector<4x128x128xf32>
    %13 = arith.addf %10, %12 : vector<4x128x128xf32>
    %cst_15 = arith.constant dense<0xFF800000> : vector<4x128xf32>
    %14 = vector.multi_reduction <maximumf>, %13, %cst_15 [2] : vector<4x128x128xf32> to vector<4x128xf32>
    %15 = vector.shape_cast %14 : vector<4x128xf32> to vector<4x128x1xf32>
    %16 = vector.broadcast %15 : vector<4x128x1xf32> to vector<4x128x128xf32>
    %17 = arith.subf %13, %16 : vector<4x128x128xf32>
    %18 = math.exp %17 : vector<4x128x128xf32>
    %cst_16 = arith.constant dense<0.000000e+00> : vector<4x128xf32>
    %19 = vector.multi_reduction <add>, %18, %cst_16 [2] : vector<4x128x128xf32> to vector<4x128xf32>
    %20 = vector.shape_cast %19 : vector<4x128xf32> to vector<4x128x1xf32>
    %21 = tpu.reciprocal %20 {approx = true} : vector<4x128x1xf32> -> vector<4x128x1xf32>
    %22 = vector.broadcast %21 : vector<4x128x1xf32> to vector<4x128x128xf32>
    %23 = arith.mulf %18, %22 : vector<4x128x128xf32>
    %c0_17 = arith.constant 0 : index
    %c0_18 = arith.constant 0 : index
    %c0_19 = arith.constant 0 : index
    %c0_20 = arith.constant 0 : index
    %24 = vector.load %arg6[%c0_17, %c0_18, %c0_19, %c0_20] : memref<1x4x128x128xf32, #tpu.memory_space<vmem>>, vector<1x4x128x128xf32>
    %25 = vector.shape_cast %24 : vector<1x4x128x128xf32> to vector<4x128x128xf32>
    %26 = vector.shape_cast %23 : vector<4x128x128xf32> to vector<1x4x128x128xf32>
    tpu.vector_store %arg6[%c0_17, %c0_18, %c0_19, %c0_20], %26 {strides = array<i32>} : memref<1x4x128x128xf32, #tpu.memory_space<vmem>>, vector<1x4x128x128xf32>,
    %27 = arith.truncf %23 : vector<4x128x128xf32> to vector<4x128x128xbf16>
    %28 = vector.extract_strided_slice %27 {offsets = [0, 0, 0], sizes = [1, 128, 128], strides = [1, 1, 1]} : vector<4x128x128xbf16> to vector<1x128x128xbf16>
    %29 = vector.shape_cast %28 : vector<1x128x128xbf16> to vector<128x128xbf16>
    %30 = vector.extract_strided_slice %5 {offsets = [0, 0, 0], sizes = [1, 128, 64], strides = [1, 1, 1]} : vector<4x128x64xbf16> to vector<1x128x64xbf16>
    %31 = vector.shape_cast %30 : vector<1x128x64xbf16> to vector<128x64xbf16>
    %cst_21 = arith.constant dense<0.000000e+00> : vector<128x64xf32>
    %32 = tpu.matmul %29, %31, %cst_21 {dimension_numbers = #tpu.dot_dimension_numbers<[1], [0], [0], [1], [0, 0, 1, 1], [], []>} : vector<128x128xbf16>, vector<128x64xbf16>, vector<128x64xf32> -> vector<128x64xf32>
    %33 = vector.extract_strided_slice %27 {offsets = [1, 0, 0], sizes = [1, 128, 128], strides = [1, 1, 1]} : vector<4x128x128xbf16> to vector<1x128x128xbf16>
    %34 = vector.shape_cast %33 : vector<1x128x128xbf16> to vector<128x128xbf16>
    %35 = vector.extract_strided_slice %5 {offsets = [1, 0, 0], sizes = [1, 128, 64], strides = [1, 1, 1]} : vector<4x128x64xbf16> to vector<1x128x64xbf16>
    %36 = vector.shape_cast %35 : vector<1x128x64xbf16> to vector<128x64xbf16>
    %cst_22 = arith.constant dense<0.000000e+00> : vector<128x64xf32>
    %37 = tpu.matmul %34, %36, %cst_22 {dimension_numbers = #tpu.dot_dimension_numbers<[1], [0], [0], [1], [0, 0, 1, 1], [], []>} : vector<128x128xbf16>, vector<128x64xbf16>, vector<128x64xf32> -> vector<128x64xf32>
    %38 = vector.extract_strided_slice %27 {offsets = [2, 0, 0], sizes = [1, 128, 128], strides = [1, 1, 1]} : vector<4x128x128xbf16> to vector<1x128x128xbf16>
    %39 = vector.shape_cast %38 : vector<1x128x128xbf16> to vector<128x128xbf16>
    %40 = vector.extract_strided_slice %5 {offsets = [2, 0, 0], sizes = [1, 128, 64], strides = [1, 1, 1]} : vector<4x128x64xbf16> to vector<1x128x64xbf16>
    %41 = vector.shape_cast %40 : vector<1x128x64xbf16> to vector<128x64xbf16>
    %cst_23 = arith.constant dense<0.000000e+00> : vector<128x64xf32>
    %42 = tpu.matmul %39, %41, %cst_23 {dimension_numbers = #tpu.dot_dimension_numbers<[1], [0], [0], [1], [0, 0, 1, 1], [], []>} : vector<128x128xbf16>, vector<128x64xbf16>, vector<128x64xf32> -> vector<128x64xf32>
    %43 = vector.extract_strided_slice %27 {offsets = [3, 0, 0], sizes = [1, 128, 128], strides = [1, 1, 1]} : vector<4x128x128xbf16> to vector<1x128x128xbf16>
    %44 = vector.shape_cast %43 : vector<1x128x128xbf16> to vector<128x128xbf16>
    %45 = vector.extract_strided_slice %5 {offsets = [3, 0, 0], sizes = [1, 128, 64], strides = [1, 1, 1]} : vector<4x128x64xbf16> to vector<1x128x64xbf16>
    %46 = vector.shape_cast %45 : vector<1x128x64xbf16> to vector<128x64xbf16>
    %cst_24 = arith.constant dense<0.000000e+00> : vector<128x64xf32>
    %47 = tpu.matmul %44, %46, %cst_24 {dimension_numbers = #tpu.dot_dimension_numbers<[1], [0], [0], [1], [0, 0, 1, 1], [], []>} : vector<128x128xbf16>, vector<128x64xbf16>, vector<128x64xf32> -> vector<128x64xf32>
    %48 = tpu.concatenate %32, %37, %42, %47 in 1 : vector<128x64xf32>, vector<128x64xf32>, vector<128x64xf32>, vector<128x64xf32> -> vector<128x256xf32>
    %c0_25 = arith.constant 0 : index
    %c0_26 = arith.constant 0 : index
    %c0_27 = arith.constant 0 : index
    %49 = vector.load %arg5[%c0_25, %c0_26, %c0_27] : memref<1x128x256xf32, #tpu.memory_space<vmem>>, vector<1x128x256xf32>
    %50 = vector.shape_cast %49 : vector<1x128x256xf32> to vector<128x256xf32>
    %51 = vector.shape_cast %48 : vector<128x256xf32> to vector<1x128x256xf32>
    tpu.vector_store %arg5[%c0_25, %c0_26, %c0_27], %51 {strides = array<i32>} : memref<1x128x256xf32, #tpu.memory_space<vmem>>, vector<1x128x256xf32>,
    return
  }
  func.func @transform_0(%arg0: i32) -> (i32, i32, i32, i32) {
    %c0_i32 = arith.constant 0 : i32
    %c0_i32_0 = arith.constant 0 : i32
    %c0_i32_1 = arith.constant 0 : i32
    %c0_i32_2 = arith.constant 0 : i32
    return %arg0, %c0_i32, %c0_i32_0, %c0_i32_1 : i32, i32, i32, i32
  }
  func.func @transform_1(%arg0: i32) -> (i32, i32, i32, i32) {
    %c0_i32 = arith.constant 0 : i32
    %c0_i32_0 = arith.constant 0 : i32
    %c0_i32_1 = arith.constant 0 : i32
    %c0_i32_2 = arith.constant 0 : i32
    return %arg0, %c0_i32, %c0_i32_0, %c0_i32_1 : i32, i32, i32, i32
  }
  func.func @transform_2(%arg0: i32) -> (i32, i32, i32, i32) {
    %c0_i32 = arith.constant 0 : i32
    %c0_i32_0 = arith.constant 0 : i32
    %c0_i32_1 = arith.constant 0 : i32
    %c0_i32_2 = arith.constant 0 : i32
    return %arg0, %c0_i32, %c0_i32_0, %c0_i32_1 : i32, i32, i32, i32
  }
  func.func @transform_3(%arg0: i32) -> (i32, i32, i32) {
    %c0_i32 = arith.constant 0 : i32
    %c0_i32_0 = arith.constant 0 : i32
    %c0_i32_1 = arith.constant 0 : i32
    return %arg0, %c0_i32, %c0_i32_0 : i32, i32, i32
  }
  func.func @transform_4(%arg0: i32) -> (i32, i32, i32) {
    %c0_i32 = arith.constant 0 : i32
    %c0_i32_0 = arith.constant 0 : i32
    %c0_i32_1 = arith.constant 0 : i32
    return %arg0, %c0_i32, %c0_i32_0 : i32, i32, i32
  }
  func.func @transform_5(%arg0: i32) -> (i32, i32, i32, i32) {
    %c0_i32 = arith.constant 0 : i32
    %c0_i32_0 = arith.constant 0 : i32
    %c0_i32_1 = arith.constant 0 : i32
    %c0_i32_2 = arith.constant 0 : i32
    return %arg0, %c0_i32, %c0_i32_0, %c0_i32_1 : i32, i32, i32, i32
  }
}

</mosaic_0001>

<bundles_post_ra>
// kernel: scaled_dot_product_attention.1
= control target key start
LH: loop header
LB: loop body
LE: loop exit
PB: predicated region body
PF: predicated region fallthrough
CT: control target
= control target key end

     0   :  { %11 = vsyncpa [#allocation3], 0  ;;  %s5392_s0 = inlined_call_operand.vmem [shape: bf16[2,4,128,64], index: 0, kind: input, shape index: {}]   ;;  %s5393_s1 = inlined_call_operand.vmem [shape: bf16[2,4,128,64], index: 1, kind: input, shape index: {}]   ;;  %s5394_s2 = inlined_call_operand.vmem [shape: bf16[2,4,128,64], index: 2, kind: input, shape index: {}]   ;;  %s5395_s3 = inlined_call_operand.vmem [shape: f32[2,128,128], index: 3, kind: input, shape index: {}]   ;;  %s5396_s4 = inlined_call_operand.vmem [shape: f32[2,128,256], index: 4, kind: output, shape index: {0}]   ;;  %s5397_s5 = inlined_call_operand.hbm [shape: f32[2,4,128,128], index: 5, kind: output, shape index: {1}]  }
   0x1   :  { %13 = vsyncpa [#allocation3 + $0x1], 0  ;;  %s4185_s18 = smov 0   ;;  %s4187_s19 = smov 0  }
   0x2   :  { %s4189_s20 = smov 0   ;;  %s4191_s21 = smov 0  }
   0x3 LB: > { %s4206_s22 = sadd.s32 4294967295, %s4149_s21   ;;  %s3123_s23 = sadd.s32 4294967294, %s4149_s21   ;;  %s4149_s21 = sphi %s4191_s21, %s5496_s21   ;;  %s4145_s20 = sphi %s4189_s20, %s5495_s20   ;;  %s4141_s19 = sphi %s4187_s19, %s5494_s19   ;;  %s4137_s18 = sphi %s4185_s18, %s5493_s18  }
   0x4   : > { %s4210_s24 = sadd.s32 1, %s4149_s21   ;;  %s156_s25 = sadd.s32 1, %s4145_s20 }
   0x5   : > { %s153_s26 = ssub.s32 %s4149_s21, %s4210_s24  ;;  %p166_p0 = scmp.ne.s32.totalorder %s4145_s20, %s4141_s19 }
   0x6   : > { %p154_p1 = scmp.eq.s32.totalorder %s153_s26, 0  ;;  %p167_p2 = scmp.eq.s32.totalorder %s4206_s22, 1 }
   0x7   : > { %p172_p3 = scmp.ne.s32.totalorder %s4141_s19, %s4137_s18  ;;  %p173_p4 = scmp.eq.s32.totalorder %s3123_s23, 1 }
   0x8   : > { %s4221_s27 = scalar_select %p154_p1, %s4145_s20, %s156_s25  }
   0x9   : > { %p4223_p5 = por %p167_p2, %p166_p0  ;;  %p4227_p6 = por %p173_p4, %p172_p3 }
   0xa   : > { %p3126_p7 = scmp.ge.s32.totalorder %s4149_s21, 1  ;;  %p223_p8 = scmp.lt.s32.totalorder %s4149_s21, 3 }
   0xc   : > { %p224_p9 = pnand %p3126_p7, %p223_p8 }
   0xe   : > { %227 = sbr.rel (%p224_p9) target bundleno = 1078 (0x436), region = 36 }
  0x15   : > { %p271_p10 = scmp.lt.s32.totalorder %s4206_s22, 1  ;;  %vm585_vm0 = vcmask 523264   ;;  %s268_s26 = sand.u32 1, %s4141_s19  }
  0x16   : > { %s4151_s8 = smov 64   ;;  %s5277_s14 = scalar_lea.sflag [#allocation3], %s268_s26 }
  0x17   : > { %s4235_s30 = scalar_select %p271_p10, %s4206_s22, 1 }
  0x18   : > { %s4152_s15 = smov [#allocation2]  }
  0x19   : > { %s4238_s6 = sshll.u32 %s4235_s30, 8  ;;  %s3274_s13 = sshll.u32 %s4235_s30, 7 }
  0x1a   : > { %s4244_s9 = scalar_lea.vmem %s5393_s1, %s4238_s6  ;;  %s4266_s12 = scalar_lea.vmem %s5392_s0, %s4238_s6 }
  0x1b   : > { %v3735_v0 = vld [vmem:[%s4244_s9] sm:$0xff]   ;;  %v3737_v3 = vld [vmem:[%s4244_s9 + $0x8] sm:$0xff]   ;;  %v3739_v7 = vld [vmem:[%s4244_s9 + $0x10] sm:$0xff]   ;;  %s4416_s16 = scalar_lea.vmem %s5395_s3, %s3274_s13  ;;  %s4762_s25 = scalar_lea.vmem %s5394_s2, %s4238_s6 }
  0x1c   : > { %v3736_v1 = vld [vmem:[%s4244_s9 + $0x40] sm:$0xff]   ;;  %3661 = vmatprep.subr.msk.bf16.mxu0 %vm585_vm0, %v3735_v0  ;;  %v611_v2 = vsel %vm585_vm0, %v3735_v0, 0  ;;  %v3738_v5 = vld [vmem:[%s4244_s9 + $0x48] sm:$0xff]   ;;  %v614_v6 = vsel %vm585_vm0, %v3737_v3, 0  ;;  %v3740_v9 = vld [vmem:[%s4244_s9 + $0x50] sm:$0xff]   ;;  %v617_v12 = vsel %vm585_vm0, %v3739_v7, 0 }
  0x1d   : > { %3669 = vmatprep.subr.msk.bf16.mxu1 %vm585_vm0, %v3736_v1  ;;  %3406 = vmatpush3.bf16.xpose.msra.mxu0 %v611_v2  ;;  %v836_v4 = vsel %vm585_vm0, %v3736_v1, 0  ;;  %v839_v8 = vsel %vm585_vm0, %v3738_v5, 0  ;;  %v3741_v10 = vld [vmem:[%s4244_s9 + $0x18] sm:$0xff]   ;;  %v3751_v13 = vld [vmem:[%s4266_s12] sm:$0xff]   ;;  %v842_v14 = vsel %vm585_vm0, %v3740_v9, 0  ;;  %v3745_v21 = vld [vmem:[%s4244_s9 + $0x28] sm:$0xff]  }
  0x1e   : > { %3438 = vmatpush3.bf16.xpose.msra.mxu1 %v836_v4  ;;  %3662 = vmatprep.subr.msk.bf16.mxu0 %vm585_vm0, %v3737_v3  ;;  %v3742_v11 = vld [vmem:[%s4244_s9 + $0x58] sm:$0xff]   ;;  %v3752_v15 = vld [vmem:[%s4266_s12 + $0x40] sm:$0xff]   ;;  %v620_v16 = vsel %vm585_vm0, %v3741_v10, 0  ;;  %v3746_v23 = vld [vmem:[%s4244_s9 + $0x68] sm:$0xff]   ;;  %v626_v24 = vsel %vm585_vm0, %v3745_v21, 0  ;;  %s3127_s30 = sshll.u32 %s268_s26, 9 }
  0x1f   : > { %3670 = vmatprep.subr.msk.bf16.mxu1 %vm585_vm0, %v3738_v5  ;;  %3421 = vmatprep.mubr.msk.bf16.mxu0 %vm585_vm0, %v3751_v13  ;;  %v3743_v17 = vld [vmem:[%s4244_s9 + $0x20] sm:$0xff]   ;;  %v845_v18 = vsel %vm585_vm0, %v3742_v11, 0  ;;  %v3747_v25 = vld [vmem:[%s4244_s9 + $0x30] sm:$0xff]   ;;  %v851_v26 = vsel %vm585_vm0, %v3746_v23, 0  ;;  %v3749_v29 = vld [vmem:[%s4244_s9 + $0x38] sm:$0xff]   ;;  %s5079_s7 = scalar_lea.vmem [#allocation2], %s3127_s30 }
  0x20   : > { %3453 = vmatprep.mubr.msk.bf16.mxu1 %vm585_vm0, %v3752_v15  ;;  %v3744_v19 = vld [vmem:[%s4244_s9 + $0x60] sm:$0xff]   ;;  %v623_v20 = vsel %vm585_vm0, %v3743_v17, 0  ;;  %v3748_v27 = vld [vmem:[%s4244_s9 + $0x70] sm:$0xff]   ;;  %v629_v28 = vsel %vm585_vm0, %v3747_v25, 0  ;;  %v3750_v31 = vld [vmem:[%s4244_s9 + $0x78] sm:$0xff]   ;;  %v632_v32 = vsel %vm585_vm0, %v3749_v29, 0 }
  0x21   : > { %v848_v22 = vsel %vm585_vm0, %v3744_v19, 0  ;;  %v854_v30 = vsel %vm585_vm0, %v3748_v27, 0  ;;  %v3756_v33 = vld [vmem:[%s4244_s9 + $0x80] sm:$0xff]   ;;  %v857_v34 = vsel %vm585_vm0, %v3750_v31, 0  ;;  %v3753_v36 = vld [vmem:[%s4266_s12 + $0x8] sm:$0xff]   ;;  %v3759_v42 = vld [vmem:[%s4266_s12 + $0x50] sm:$0xff]  }
  0x22   : > { %v3755_v35 = vld [vmem:[%s4244_s9 + $0xc0] sm:$0xff]   ;;  %v3754_v37 = vld [vmem:[%s4266_s12 + $0x48] sm:$0xff]   ;;  %v1061_v38 = vsel %vm585_vm0, %v3756_v33, 0  ;;  %v3761_v43 = vld [vmem:[%s4266_s12 + $0x10] sm:$0xff]   ;;  %s3000_s10 = sshll.u32 %s5079_s7, 4  ;;  %s5272_s10 = int_to_ptr.vmem [resolvable:$true] %s3000_s10 }
  0x23   : > { %v3758_v39 = vld [vmem:[%s4244_s9 + $0x88] sm:$0xff]   ;;  %v1286_v40 = vsel %vm585_vm0, %v3755_v35, 0  ;;  %v3763_v44 = vld [vmem:[%s4266_s12 + $0x18] sm:$0xff]   ;;  %v3764_v47 = vld [vmem:[%s4244_s9 + $0x90] sm:$0xff]  }
  0x24   : > { %v3757_v41 = vld [vmem:[%s4244_s9 + $0xc8] sm:$0xff]   ;;  %v3760_v45 = vld [vmem:[%s4266_s12 + $0x58] sm:$0xff]   ;;  %v1064_v46 = vsel %vm585_vm0, %v3758_v39, 0  ;;  %v3762_v49 = vld [vmem:[%s4244_s9 + $0xd0] sm:$0xff]   ;;  %v1067_v54 = vsel %vm585_vm0, %v3764_v47, 0 }
  0x25   : > { %3408 = vmatpush3.bf16.xpose.msra.mxu0 %v614_v6  ;;  %v1289_v48 = vsel %vm585_vm0, %v3757_v41, 0  ;;  %v3767_v50 = vld [vmem:[%s4266_s12 + $0x60] sm:$0xff]   ;;  %v3771_v52 = vld [vmem:[%s4266_s12 + $0x28] sm:$0xff]   ;;  %v3766_v55 = vld [vmem:[%s4244_s9 + $0x98] sm:$0xff]   ;;  %v1292_v56 = vsel %vm585_vm0, %v3762_v49, 0 }
  0x26   : > { %3440 = vmatpush3.bf16.xpose.msra.mxu1 %v839_v8  ;;  %3663 = vmatprep.subr.msk.bf16.mxu0 %vm585_vm0, %v3739_v7  ;;  %v3769_v51 = vld [vmem:[%s4266_s12 + $0x20] sm:$0xff]   ;;  %v3768_v53 = vld [vmem:[%s4266_s12 + $0x68] sm:$0xff]   ;;  %v3765_v57 = vld [vmem:[%s4244_s9 + $0xd8] sm:$0xff]   ;;  %v1070_v62 = vsel %vm585_vm0, %v3766_v55, 0 }
  0x27   : > { %3671 = vmatprep.subr.msk.bf16.mxu1 %vm585_vm0, %v3740_v9  ;;  %v3775_v58 = vld [vmem:[%s4266_s12 + $0x70] sm:$0xff]   ;;  %v3779_v60 = vld [vmem:[%s4266_s12 + $0x38] sm:$0xff]   ;;  %v3772_v63 = vld [vmem:[%s4244_s9 + $0xa0] sm:$0xff]   ;;  %v1295_v0 = vsel %vm585_vm0, %v3765_v57, 0 }
  0x28   : > { %v3777_v59 = vld [vmem:[%s4266_s12 + $0x30] sm:$0xff]   ;;  %v3776_v61 = vld [vmem:[%s4266_s12 + $0x78] sm:$0xff]   ;;  %v3770_v1 = vld [vmem:[%s4244_s9 + $0xe0] sm:$0xff]   ;;  %v1073_v4 = vsel %vm585_vm0, %v3772_v63, 0 }
  0x29   : > { %v3783_v2 = vld [vmem:[%s4266_s12 + $0xc0] sm:$0xff]   ;;  %v3774_v5 = vld [vmem:[%s4244_s9 + $0xa8] sm:$0xff]   ;;  %v1298_v6 = vsel %vm585_vm0, %v3770_v1, 0  ;;  %v3780_v9 = vld [vmem:[%s4244_s9 + $0xb0] sm:$0xff]  }
  0x2a   : > { %v3784_v3 = vld [vmem:[%s4266_s12 + $0x80] sm:$0xff]   ;;  %v3773_v7 = vld [vmem:[%s4244_s9 + $0xe8] sm:$0xff]   ;;  %v1076_v8 = vsel %vm585_vm0, %v3774_v5, 0  ;;  %v3782_v13 = vld [vmem:[%s4244_s9 + $0xb8] sm:$0xff]  }
  0x2b   : > { %v3781_v15 = vld [vmem:[%s4244_s9 + $0xf8] sm:$0xff]  }
  0x2d   : > { %3410 = vmatpush3.bf16.xpose.msra.mxu0 %v617_v12  ;;  %v1079_v12 = vsel %vm585_vm0, %v3780_v9, 0 }
  0x2e   : > { %3442 = vmatpush3.bf16.xpose.msra.mxu1 %v842_v14  ;;  %3664 = vmatprep.subr.msk.bf16.mxu0 %vm585_vm0, %v3741_v10  ;;  %v1301_v10 = vsel %vm585_vm0, %v3773_v7, 0 }
  0x2f   : > { %3672 = vmatprep.subr.msk.bf16.mxu1 %vm585_vm0, %v3742_v11  ;;  %v3778_v11 = vld [vmem:[%s4244_s9 + $0xf0] sm:$0xff]   ;;  %s3276_s9 = sshll.u32 %s4206_s22, 13  ;;  %s4087_s22 = scalar_lea.vmem %s5272_s10, 8192 }
  0x30   : > { %v1304_v14 = vsel %vm585_vm0, %v3778_v11, 0  ;;  %s5269_s13 = scalar_lea.hbm %s5397_s5, %s3276_s9  ;;  %p4088_p11 = scmp.ne.s32.totalorder %s5272_s10, %s4087_s22 }
  0x32   : > { %p4089_p12 = pnand %p4088_p11, %p4223_p5 }
  0x34   : > { %p4090_p13 = pneg %p4089_p12 }
  0x35   : > { %3412 = vmatpush3.bf16.xpose.msra.mxu0 %v620_v16  ;;  %v1082_v16 = vsel %vm585_vm0, %v3782_v13, 0 }
  0x36   : > { %3444 = vmatpush3.bf16.xpose.msra.mxu1 %v845_v18  ;;  %3665 = vmatprep.subr.msk.bf16.mxu0 %vm585_vm0, %v3743_v17  ;;  %v1307_v17 = vsel %vm585_vm0, %v3781_v15, 0  ;;  %v3786_v18 = vld [vmem:[%s4266_s12 + $0x88] sm:$0xff]  }
  0x37   : > { %3673 = vmatprep.subr.msk.bf16.mxu1 %vm585_vm0, %v3744_v19  ;;  %v3785_v19 = vld [vmem:[%s4266_s12 + $0xc8] sm:$0xff]  }
  0x3d   : > { %3414 = vmatpush3.bf16.xpose.msra.mxu0 %v623_v20  ;;  %v3789_v20 = vld [vmem:[%s4266_s12 + $0x90] sm:$0xff]  }
  0x3e   : > { %3446 = vmatpush3.bf16.xpose.msra.mxu1 %v848_v22  ;;  %3666 = vmatprep.subr.msk.bf16.mxu0 %vm585_vm0, %v3745_v21  ;;  %v3787_v21 = vld [vmem:[%s4266_s12 + $0xd0] sm:$0xff]   ;;  %v3790_v22 = vld [vmem:[%s4266_s12 + $0x98] sm:$0xff]  }
  0x3f   : > { %3674 = vmatprep.subr.msk.bf16.mxu1 %vm585_vm0, %v3746_v23  ;;  %v3788_v23 = vld [vmem:[%s4266_s12 + $0xd8] sm:$0xff]  }
  0x45   : > { %3416 = vmatpush3.bf16.xpose.msra.mxu0 %v626_v24  ;;  %v3795_v24 = vld [vmem:[%s4266_s12 + $0xa0] sm:$0xff]  }
  0x46   : > { %3448 = vmatpush3.bf16.xpose.msra.mxu1 %v851_v26  ;;  %3667 = vmatprep.subr.msk.bf16.mxu0 %vm585_vm0, %v3747_v25  ;;  %v3791_v25 = vld [vmem:[%s4266_s12 + $0xe0] sm:$0xff]   ;;  %v3796_v26 = vld [vmem:[%s4266_s12 + $0xa8] sm:$0xff]  }
  0x47   : > { %3675 = vmatprep.subr.msk.bf16.mxu1 %vm585_vm0, %v3748_v27  ;;  %v3792_v27 = vld [vmem:[%s4266_s12 + $0xe8] sm:$0xff]  }
  0x4d   : > { %3418 = vmatpush3.bf16.xpose.msra.mxu0 %v629_v28  ;;  %v3797_v28 = vld [vmem:[%s4266_s12 + $0xb0] sm:$0xff]  }
  0x4e   : > { %3450 = vmatpush3.bf16.xpose.msra.mxu1 %v854_v30  ;;  %3668 = vmatprep.subr.msk.bf16.mxu0 %vm585_vm0, %v3749_v29  ;;  %v3793_v29 = vld [vmem:[%s4266_s12 + $0xf0] sm:$0xff]   ;;  %v3798_v30 = vld [vmem:[%s4266_s12 + $0xb8] sm:$0xff]  }
  0x4f   : > { %3676 = vmatprep.subr.msk.bf16.mxu1 %vm585_vm0, %v3750_v31  ;;  %v3794_v31 = vld [vmem:[%s4266_s12 + $0xf8] sm:$0xff]  }
  0x55   : > { %3420 = vmatpush3.bf16.xpose.msra.mxu0 %v632_v32 }
  0x56   : > { %3452 = vmatpush3.bf16.xpose.msra.mxu1 %v857_v34  ;;  %3677 = vmatprep.subr.msk.bf16.mxu0 %vm585_vm0, %v3756_v33  ;;  %v4419_v33 = vld [vmem:[%s4416_s16 + $0x10] sm:$0xff] }
  0x57   : > { %3685 = vmatprep.subr.msk.bf16.mxu1 %vm585_vm0, %v3755_v35 }
  0x5c   : > { %3422 = vmatmul.mubr.msk.bf16.vlgmr.msra.gmra.mrb[0].mxu0 %vm585_vm0, %v3753_v36 }
  0x5d   : > { %3454 = vmatmul.mubr.msk.bf16.vlgmr.msra.gmra.mrb[0].mxu1 %vm585_vm0, %v3754_v37  ;;  %3470 = vmatpush3.bf16.xpose.msra.mxu0 %v1061_v38 }
  0x5e   : > { %3502 = vmatpush3.bf16.xpose.msra.mxu1 %v1286_v40  ;;  %3678 = vmatprep.subr.msk.bf16.mxu0 %vm585_vm0, %v3758_v39 }
  0x5f   : > { %3686 = vmatprep.subr.msk.bf16.mxu1 %vm585_vm0, %v3757_v41  ;;  %3457 = vmatprep.mubr.msk.bf16.mxu1 %vm585_vm0, %v3759_v42 }
  0x60   : > { %3425 = vmatprep.mubr.msk.bf16.mxu0 %vm585_vm0, %v3761_v43 }
  0x64   : > { %3426 = vmatmul.mubr.msk.bf16.gmra.mrb[4].mxu0 %vm585_vm0, %v3763_v44 }
  0x65   : > { %3472 = vmatpush3.bf16.xpose.msra.mxu0 %v1064_v46  ;;  %3458 = vmatmul.mubr.msk.bf16.gmra.mrb[4].mxu1 %vm585_vm0, %v3760_v45 }
  0x66   : > { %3504 = vmatpush3.bf16.xpose.msra.mxu1 %v1289_v48  ;;  %3679 = vmatprep.subr.msk.bf16.mxu0 %vm585_vm0, %v3764_v47  ;;  %v4428_v47 = vld [vmem:[%s4416_s16] sm:$0xff]  ;;  %v4432_v48 = vld [vmem:[%s4416_s16 + $0x18] sm:$0xff] }
  0x67   : > { %3687 = vmatprep.subr.msk.bf16.mxu1 %vm585_vm0, %v3762_v49  ;;  %3461 = vmatprep.mubr.msk.bf16.mxu1 %vm585_vm0, %v3767_v50 }
  0x68   : > { %3429 = vmatprep.mubr.msk.bf16.mxu0 %vm585_vm0, %v3769_v51 }
  0x6c   : > { %3430 = vmatmul.mubr.msk.bf16.gmra.mrb[8].mxu0 %vm585_vm0, %v3771_v52 }
  0x6d   : > { %3474 = vmatpush3.bf16.xpose.msra.mxu0 %v1067_v54  ;;  %3462 = vmatmul.mubr.msk.bf16.gmra.mrb[8].mxu1 %vm585_vm0, %v3768_v53 }
  0x6e   : > { %3506 = vmatpush3.bf16.xpose.msra.mxu1 %v1292_v56  ;;  %3680 = vmatprep.subr.msk.bf16.mxu0 %vm585_vm0, %v3766_v55 }
  0x6f   : > { %3688 = vmatprep.subr.msk.bf16.mxu1 %vm585_vm0, %v3765_v57  ;;  %3465 = vmatprep.mubr.msk.bf16.mxu1 %vm585_vm0, %v3775_v58 }
  0x70   : > { %3433 = vmatprep.mubr.msk.bf16.mxu0 %vm585_vm0, %v3777_v59 }
  0x74   : > { %3434 = vmatmul.mubr.msk.bf16.gmra.mrb[12].mxu0 %vm585_vm0, %v3779_v60 }
  0x75   : > { %3476 = vmatpush3.bf16.xpose.msra.mxu0 %v1070_v62  ;;  %3466 = vmatmul.mubr.msk.bf16.gmra.mrb[12].mxu1 %vm585_vm0, %v3776_v61 }
  0x76   : > { %3508 = vmatpush3.bf16.xpose.msra.mxu1 %v1295_v0  ;;  %3681 = vmatprep.subr.msk.bf16.mxu0 %vm585_vm0, %v3772_v63 }
  0x77   : > { %3689 = vmatprep.subr.msk.bf16.mxu1 %vm585_vm0, %v3770_v1  ;;  %3517 = vmatprep.mubr.msk.bf16.mxu1 %vm585_vm0, %v3783_v2  ;;  %v4450_v1 = vld [vmem:[%s4416_s16 + $0x8] sm:$0xff] }
  0x78   : > { %3485 = vmatprep.mubr.msk.bf16.mxu0 %vm585_vm0, %v3784_v3 }
  0x7d   : > { %3478 = vmatpush3.bf16.xpose.msra.mxu0 %v1073_v4  ;;  %v4455_v4 = vld [vmem:[%s4416_s16 + $0x30] sm:$0xff] }
  0x7e   : > { %3510 = vmatpush3.bf16.xpose.msra.mxu1 %v1298_v6  ;;  %3682 = vmatprep.subr.msk.bf16.mxu0 %vm585_vm0, %v3774_v5  ;;  %v4461_v6 = vld [vmem:[%s4416_s16 + $0x38] sm:$0xff] }
  0x7f   : > { %3690 = vmatprep.subr.msk.bf16.mxu1 %vm585_vm0, %v3773_v7 }
  0x85   : > { %3480 = vmatpush3.bf16.xpose.msra.mxu0 %v1076_v8 }
  0x86   : > { %3512 = vmatpush3.bf16.xpose.msra.mxu1 %v1301_v10  ;;  %3683 = vmatprep.subr.msk.bf16.mxu0 %vm585_vm0, %v3780_v9 }
  0x87   : > { %3691 = vmatprep.subr.msk.bf16.mxu1 %vm585_vm0, %v3778_v11 }
  0x8d   : > { %3482 = vmatpush3.bf16.xpose.msra.mxu0 %v1079_v12 }
  0x8e   : > { %3514 = vmatpush3.bf16.xpose.msra.mxu1 %v1304_v14  ;;  %3684 = vmatprep.subr.msk.bf16.mxu0 %vm585_vm0, %v3782_v13 }
  0x8f   : > { %3692 = vmatprep.subr.msk.bf16.mxu1 %vm585_vm0, %v3781_v15 }
  0x95   : > { %3484 = vmatpush3.bf16.xpose.msra.mxu0 %v1082_v16 }
  0x96   : > { %3516 = vmatpush3.bf16.xpose.msra.mxu1 %v1307_v17 }
  0x9c   : > { %3486 = vmatmul.mubr.msk.bf16.vlgmr.msra.gmra.mrb[16].mxu0 %vm585_vm0, %v3786_v18 }
  0x9d   : > { %3518 = vmatmul.mubr.msk.bf16.vlgmr.msra.gmra.mrb[16].mxu1 %vm585_vm0, %v3785_v19  ;;  %3489 = vmatprep.mubr.msk.bf16.mxu0 %vm585_vm0, %v3789_v20 }
  0x9e   : > { %3521 = vmatprep.mubr.msk.bf16.mxu1 %vm585_vm0, %v3787_v21 }
  0xa4   : > { %3490 = vmatmul.mubr.msk.bf16.gmra.mrb[20].mxu0 %vm585_vm0, %v3790_v22 }
  0xa5   : > { %3522 = vmatmul.mubr.msk.bf16.gmra.mrb[20].mxu1 %vm585_vm0, %v3788_v23  ;;  %3493 = vmatprep.mubr.msk.bf16.mxu0 %vm585_vm0, %v3795_v24  ;;  %v4483_v24 = vld [vmem:[%s4416_s16 + $0x20] sm:$0xff] }
  0xa6   : > { %3525 = vmatprep.mubr.msk.bf16.mxu1 %vm585_vm0, %v3791_v25 }
  0xac   : > { %3494 = vmatmul.mubr.msk.bf16.gmra.mrb[24].mxu0 %vm585_vm0, %v3796_v26  ;;  %v4487_v26 = vld [vmem:[%s4416_s16 + $0x28] sm:$0xff] }
  0xad   : > { %3526 = vmatmul.mubr.msk.bf16.gmra.mrb[24].mxu1 %vm585_vm0, %v3792_v27  ;;  %3497 = vmatprep.mubr.msk.bf16.mxu0 %vm585_vm0, %v3797_v28 }
  0xae   : > { %3529 = vmatprep.mubr.msk.bf16.mxu1 %vm585_vm0, %v3793_v29 }
  0xb4   : > { %3498 = vmatmul.mubr.msk.bf16.gmra.mrb[28].mxu0 %vm585_vm0, %v3798_v30 }
  0xb5   : > { %3530 = vmatmul.mubr.msk.bf16.gmra.mrb[28].mxu1 %vm585_vm0, %v3794_v31 }
 0x12f   : > { %v3423_v32 = vpop.f32.mrb[0].mxu0 }
 0x130   : > { %v1408_v34 = vmul.f32 0.125, %v3423_v32  ;;  %v3455_v35 = vpop.f32.mrb[0].mxu1  ;;  %v668_v36 = vpop.f32.mrb[1].mxu0 }
 0x131   : > { %v1424_v37 = vmul.f32 0.125, %v3455_v35  ;;  %v893_v38 = vpop.f32.mrb[1].mxu1  ;;  %v3424_v39 = vpop.f32.mrb[2].mxu0  ;;  %v1406_v49 = vmul.f32 0.125, %v668_v36 }
 0x132   : > { %v1422_v40 = vmul.f32 0.125, %v893_v38  ;;  %v3456_v41 = vpop.f32.mrb[2].mxu1  ;;  %v671_v42 = vpop.f32.mrb[3].mxu0  ;;  %v4422_v43 = vadd.f32 %v1408_v34, %v4419_v33  ;;  %v1409_v51 = vmul.f32 0.125, %v3424_v39 }
 0x133   : > { %v1425_v44 = vmul.f32 0.125, %v3456_v41  ;;  %v896_v45 = vpop.f32.mrb[3].mxu1  ;;  %v4425_v46 = vadd.f32 %v1424_v37, %v4419_v33  ;;  %v4444_v59 = vadd.f32 %v1406_v49, %v4428_v47  ;;  %v1407_v62 = vmul.f32 0.125, %v671_v42  ;;  %v4499_v41 = vld [vmem:[%s4416_s16 + $0x50] sm:$0xff] }
 0x134   : > { %5431 = vst [vmem:[#allocation5_spill] sm:$0xff] %v4422_v43  ;;  %1538 = vmax.xlane.f32.xlu0 %v4422_v43  ;;  %v4436_v50 = vadd.f32 %v1422_v40, %v4428_v47  ;;  %v1423_v58 = vmul.f32 0.125, %v896_v45  ;;  %v4447_v63 = vadd.f32 %v1409_v51, %v4432_v48 }
 0x135   : > { %1570 = vmax.xlane.f32.xlu1 %v4425_v46  ;;  %v4439_v52 = vadd.f32 %v1425_v44, %v4432_v48  ;;  %v4464_v7 = vadd.f32 %v1407_v62, %v4450_v1  ;;  %v4505_v44 = vld [vmem:[%s4416_s16 + $0x58] sm:$0xff] }
 0x136   : > { %5432 = vst [vmem:[#allocation6_spill] sm:$0xff] %v4447_v63  ;;  %v4458_v5 = vadd.f32 %v1423_v58, %v4450_v1 }
 0x137   : > { %v3427_v53 = vpop.f32.mrb[4].mxu0 }
 0x138   : > { %1566 = vmax.xlane.f32.xlu0 %v4436_v50  ;;  %v3459_v54 = vpop.f32.mrb[4].mxu1  ;;  %v684_v55 = vpop.f32.mrb[5].mxu0  ;;  %v1412_v9 = vmul.f32 0.125, %v3427_v53 }
 0x139   : > { %1572 = vmax.xlane.f32.xlu1 %v4439_v52  ;;  %v909_v56 = vpop.f32.mrb[5].mxu1  ;;  %v3428_v57 = vpop.f32.mrb[6].mxu0  ;;  %v1428_v2 = vmul.f32 0.125, %v3459_v54  ;;  %v1410_v31 = vmul.f32 0.125, %v684_v55 }
 0x13a   : > { %v3460_v60 = vpop.f32.mrb[6].mxu1  ;;  %v687_v61 = vpop.f32.mrb[7].mxu0  ;;  %v1413_v13 = vmul.f32 0.125, %v3428_v57  ;;  %v4476_v20 = vadd.f32 %v1412_v9, %v4455_v4  ;;  %v1426_v22 = vmul.f32 0.125, %v909_v56 }
 0x13b   : > { %v912_v0 = vpop.f32.mrb[7].mxu1  ;;  %v1429_v3 = vmul.f32 0.125, %v3460_v60  ;;  %v4468_v10 = vadd.f32 %v1428_v2, %v4455_v4  ;;  %v1411_v36 = vmul.f32 0.125, %v687_v61  ;;  %v4502_v42 = vadd.f32 %v1410_v31, %v4483_v24  ;;  %v4527_v60 = vld [vmem:[%s4416_s16 + $0x40] sm:$0xff]  ;;  %v4531_v61 = vld [vmem:[%s4416_s16 + $0x48] sm:$0xff] }
 0x13c   : > { %1534 = vmax.xlane.f32.xlu0 %v4444_v59  ;;  %5433 = vst [vmem:[#allocation7_spill] sm:$0xff] %v4476_v20  ;;  %v4480_v21 = vadd.f32 %v1413_v13, %v4461_v6  ;;  %v1427_v23 = vmul.f32 0.125, %v912_v0  ;;  %v4491_v32 = vadd.f32 %v1426_v22, %v4483_v24  ;;  %v4571_v31 = vld [vmem:[%s4416_s16 + $0x60] sm:$0xff] }
 0x13d   : > { %1540 = vmax.xlane.f32.xlu1 %v4447_v63  ;;  %v4472_v14 = vadd.f32 %v1429_v3, %v4461_v6  ;;  %5435 = vst [vmem:[#allocation9_spill] sm:$0xff] %v4502_v42  ;;  %v4508_v45 = vadd.f32 %v1411_v36, %v4487_v26 }
 0x13e   : > { %5434 = vst [vmem:[#allocation8_spill] sm:$0xff] %v4480_v21  ;;  %v4494_v37 = vadd.f32 %v1427_v23, %v4487_v26 }
 0x13f   : > { %v3431_v8 = vpop.f32.mrb[8].mxu0  ;;  %5436 = vst [vmem:[#allocation10_spill] sm:$0xff] %v4508_v45 }
 0x140   : > { %1568 = vmax.xlane.f32.xlu0 %v4458_v5  ;;  %v3463_v11 = vpop.f32.mrb[8].mxu1  ;;  %v700_v12 = vpop.f32.mrb[9].mxu0  ;;  %v1416_v49 = vmul.f32 0.125, %v3431_v8 }
 0x141   : > { %1536 = vmax.xlane.f32.xlu1 %v4464_v7  ;;  %v925_v15 = vpop.f32.mrb[9].mxu1  ;;  %v3432_v16 = vpop.f32.mrb[10].mxu0  ;;  %v1432_v39 = vmul.f32 0.125, %v3463_v11  ;;  %v1414_v62 = vmul.f32 0.125, %v700_v12  ;;  %v4543_v11 = vld [vmem:[%s4416_s16 + $0x70] sm:$0xff]  ;;  %v4549_v12 = vld [vmem:[%s4416_s16 + $0x78] sm:$0xff] }
 0x142   : > { %v3464_v17 = vpop.f32.mrb[10].mxu1  ;;  %v703_v18 = vpop.f32.mrb[11].mxu0  ;;  %v1417_v53 = vmul.f32 0.125, %v3432_v16  ;;  %v4520_v55 = vadd.f32 %v1416_v49, %v4499_v41  ;;  %v1430_v57 = vmul.f32 0.125, %v925_v15 }
 0x143   : > { %v928_v19 = vpop.f32.mrb[11].mxu1  ;;  %v1433_v40 = vmul.f32 0.125, %v3464_v17  ;;  %v4512_v51 = vadd.f32 %v1432_v39, %v4499_v41  ;;  %v1415_v2 = vmul.f32 0.125, %v703_v18  ;;  %v4546_v13 = vadd.f32 %v1414_v62, %v4527_v60 }
 0x144   : > { %1578 = vmax.xlane.f32.xlu0 %v4468_v10  ;;  %5437 = vst [vmem:[#allocation11_spill] sm:$0xff] %v4520_v55  ;;  %v4524_v56 = vadd.f32 %v1417_v53, %v4505_v44  ;;  %v1431_v58 = vmul.f32 0.125, %v928_v19  ;;  %v4535_v0 = vadd.f32 %v1430_v57, %v4527_v60 }
 0x145   : > { %1580 = vmax.xlane.f32.xlu1 %v4472_v14  ;;  %v4516_v54 = vadd.f32 %v1433_v40, %v4505_v44  ;;  %5439 = vst [vmem:[#allocation13_spill] sm:$0xff] %v4546_v13  ;;  %v4552_v15 = vadd.f32 %v1415_v2, %v4531_v61 }
 0x146   : > { %5438 = vst [vmem:[#allocation12_spill] sm:$0xff] %v4524_v56  ;;  %v4538_v3 = vadd.f32 %v1431_v58, %v4531_v61 }
 0x147   : > { %v3435_v25 = vpop.f32.mrb[12].mxu0  ;;  %5440 = vst [vmem:[#allocation14_spill] sm:$0xff] %v4552_v15 }
 0x148   : > { %1546 = vmax.xlane.f32.xlu0 %v4476_v20  ;;  %v3467_v27 = vpop.f32.mrb[12].mxu1  ;;  %v716_v28 = vpop.f32.mrb[13].mxu0  ;;  %v1420_v16 = vmul.f32 0.125, %v3435_v25 }
 0x149   : > { %1548 = vmax.xlane.f32.xlu1 %v4480_v21  ;;  %v941_v29 = vpop.f32.mrb[13].mxu1  ;;  %v3436_v30 = vpop.f32.mrb[14].mxu0  ;;  %v1436_v8 = vmul.f32 0.125, %v3467_v27 }
 0x14a   : > { %v3468_v34 = vpop.f32.mrb[14].mxu1  ;;  %v719_v35 = vpop.f32.mrb[15].mxu0  ;;  %v1421_v18 = vmul.f32 0.125, %v3436_v30  ;;  %v4564_v22 = vadd.f32 %v1420_v16, %v4543_v11  ;;  %v1434_v25 = vmul.f32 0.125, %v941_v29  ;;  %v4575_v30 = vld [vmem:[%s4416_s16 + $0x68] sm:$0xff]  ;;  %s4091_s16 = sshll.u32 %s4152_s15, 4  ;;  %s4092_s16 = int_to_ptr.vmem [resolvable:$false] %s4091_s16 }
 0x14b   : > { %v944_v38 = vpop.f32.mrb[15].mxu1  ;;  %v1437_v9 = vmul.f32 0.125, %v3468_v34  ;;  %v4556_v17 = vadd.f32 %v1436_v8, %v4543_v11  ;;  %v1418_v34 = vmul.f32 0.125, %v716_v28  ;;  %v1419_v39 = vmul.f32 0.125, %v719_v35  ;;  %s4093_s17 = scalar_lea.vmem %s4092_s16, 16384  ;;  %p4094_p0 = scmp.lt.s32.totalorder %s5272_s10, %s4092_s16 }
 0x14c   : > { %1574 = vmax.xlane.f32.xlu0 %v4491_v32  ;;  %5441 = vst [vmem:[#allocation15_spill] sm:$0xff] %v4564_v22  ;;  %v4568_v23 = vadd.f32 %v1421_v18, %v4549_v12  ;;  %v1435_v27 = vmul.f32 0.125, %v944_v38  ;;  %v4579_v36 = vadd.f32 %v1434_v25, %v4571_v31  ;;  %p4095_p1 = scmp.lt.s32.totalorder %s4093_s17, %s4087_s22 }
 0x14d   : > { %1576 = vmax.xlane.f32.xlu1 %v4494_v37  ;;  %v4560_v19 = vadd.f32 %v1437_v9, %v4549_v12  ;;  %v4587_v29 = vadd.f32 %v1418_v34, %v4571_v31  ;;  %v4590_v38 = vadd.f32 %v1419_v39, %v4575_v30 }
 0x14e   : > { %5442 = vst [vmem:[#allocation16_spill] sm:$0xff] %v4568_v23  ;;  %v4582_v40 = vadd.f32 %v1435_v27, %v4575_v30  ;;  %p4096_p2 = por %p4095_p1, %p4094_p0 }
 0x14f   : > { %5443 = vst [vmem:[#allocation17_spill] sm:$0xff] %v4587_v29  ;;  %5444 = vst [vmem:[#allocation18_spill] sm:$0xff] %v4590_v38 }
 0x150   : > { %1542 = vmax.xlane.f32.xlu0 %v4502_v42  ;;  %p4097_p3 = pnand %p4096_p2, %p4090_p13 }
 0x151   : > { %1544 = vmax.xlane.f32.xlu1 %v4508_v45 }
 0x154   : > { %1586 = vmax.xlane.f32.xlu0 %v4512_v51 }
 0x155   : > { %1588 = vmax.xlane.f32.xlu1 %v4516_v54 }
 0x158   : > { %1554 = vmax.xlane.f32.xlu0 %v4520_v55 }
 0x159   : > { %1556 = vmax.xlane.f32.xlu1 %v4524_v56 }
 0x15c   : > { %1582 = vmax.xlane.f32.xlu0 %v4535_v0 }
 0x15d   : > { %1584 = vmax.xlane.f32.xlu1 %v4538_v3 }
 0x160   : > { %1550 = vmax.xlane.f32.xlu0 %v4546_v13 }
 0x161   : > { %1552 = vmax.xlane.f32.xlu1 %v4552_v15 }
 0x164   : > { %1594 = vmax.xlane.f32.xlu0 %v4556_v17 }
 0x165   : > { %1596 = vmax.xlane.f32.xlu1 %v4560_v19 }
 0x168   : > { %1562 = vmax.xlane.f32.xlu0 %v4564_v22 }
 0x169   : > { %1564 = vmax.xlane.f32.xlu1 %v4568_v23 }
 0x16c   : > { %1590 = vmax.xlane.f32.xlu0 %v4579_v36 }
 0x16d   : > { %1592 = vmax.xlane.f32.xlu1 %v4582_v40 }
 0x16f   : > { %v3487_v49 = vpop.f32.mrb[16].mxu0 }
 0x170   : > { %v3519_v53 = vpop.f32.mrb[16].mxu1  ;;  %1558 = vmax.xlane.f32.xlu0 %v4587_v29  ;;  %v1118_v28 = vpop.f32.mrb[17].mxu0  ;;  %v1440_v58 = vmul.f32 0.125, %v3487_v49 }
 0x171   : > { %v1456_v57 = vmul.f32 0.125, %v3519_v53  ;;  %v1343_v35 = vpop.f32.mrb[17].mxu1  ;;  %1560 = vmax.xlane.f32.xlu1 %v4590_v38  ;;  %v3488_v62 = vpop.f32.mrb[18].mxu0 }
 0x172   : > { %v3520_v2 = vpop.f32.mrb[18].mxu1  ;;  %v1121_v8 = vpop.f32.mrb[19].mxu0  ;;  %v1441_v25 = vmul.f32 0.125, %v3488_v62  ;;  %v4602_v34 = vadd.f32 %v1440_v58, %v4419_v33  ;;  %v1454_v39 = vmul.f32 0.125, %v1343_v35 }
 0x173   : > { %v1457_v9 = vmul.f32 0.125, %v3520_v2  ;;  %v1346_v16 = vpop.f32.mrb[19].mxu1  ;;  %v4595_v18 = vadd.f32 %v1456_v57, %v4419_v33  ;;  %v1438_v33 = vmul.f32 0.125, %v1118_v28  ;;  %v1439_v29 = vmul.f32 0.125, %v1121_v8 }
 0x174   : > { %5445 = vst [vmem:[#allocation19_spill] sm:$0xff] %v4602_v34  ;;  %v1455_v23 = vmul.f32 0.125, %v1346_v16  ;;  %v4609_v57 = vadd.f32 %v1441_v25, %v4432_v48  ;;  %v4615_v35 = vadd.f32 %v1454_v39, %v4428_v47 }
 0x175   : > { %1634 = vmax.xlane.f32.xlu0 %v4595_v18  ;;  %v4599_v27 = vadd.f32 %v1457_v9, %v4432_v48  ;;  %v4623_v48 = vadd.f32 %v1438_v33, %v4428_v47  ;;  %v4629_v8 = vadd.f32 %v1439_v29, %v4450_v1 }
 0x176   : > { %5446 = vst [vmem:[#allocation20_spill] sm:$0xff] %v4609_v57  ;;  %v4619_v16 = vadd.f32 %v1455_v23, %v4450_v1 }
 0x177   : > { %1636 = vmax.xlane.f32.xlu1 %v4599_v27  ;;  %v4605_v49 = vpop.f32.mrb[20].mxu0  ;;  %5447 = vst [vmem:[#allocation21_spill] sm:$0xff] %v4623_v48  ;;  %5448 = vst [vmem:[#allocation22_spill] sm:$0xff] %v4629_v8 }
 0x178   : > { %v3523_v53 = vpop.f32.mrb[20].mxu1  ;;  %v1134_v2 = vpop.f32.mrb[21].mxu0 }
 0x179   : > { %1602 = vmax.xlane.f32.xlu0 %v4602_v34  ;;  %v1359_v62 = vpop.f32.mrb[21].mxu1  ;;  %v4611_v22 = vpop.f32.mrb[22].mxu0  ;;  %v1460_v56 = vmul.f32 0.125, %v3523_v53 }
 0x17a   : > { %v3524_v9 = vpop.f32.mrb[22].mxu1  ;;  %v1137_v38 = vpop.f32.mrb[23].mxu0  ;;  %v1458_v13 = vmul.f32 0.125, %v1359_v62 }
 0x17b   : > { %1604 = vmax.xlane.f32.xlu1 %v4609_v57  ;;  %v1362_v58 = vpop.f32.mrb[23].mxu1  ;;  %v1461_v34 = vmul.f32 0.125, %v3524_v9  ;;  %v4632_v39 = vadd.f32 %v1460_v56, %v4455_v4  ;;  %v1442_v9 = vmul.f32 0.125, %v1134_v2  ;;  %v1443_v20 = vmul.f32 0.125, %v1137_v38 }
 0x17c   : > { %v1459_v33 = vmul.f32 0.125, %v1362_v58  ;;  %v4641_v1 = vadd.f32 %v1458_v13, %v4483_v24 }
 0x17d   : > { %1630 = vmax.xlane.f32.xlu0 %v4615_v35  ;;  %v4648_v2 = vadd.f32 %v1442_v9, %v4483_v24  ;;  %v4653_v38 = vadd.f32 %v1443_v20, %v4487_v26 }
 0x17e   : > { %v4645_v58 = vadd.f32 %v1459_v33, %v4487_v26 }
 0x17f   : > { %1632 = vmax.xlane.f32.xlu1 %v4619_v16  ;;  %v4625_v25 = vpop.f32.mrb[24].mxu0 }
 0x180   : > { %v3527_v28 = vpop.f32.mrb[24].mxu1  ;;  %v1150_v57 = vpop.f32.mrb[25].mxu0 }
 0x181   : > { %1598 = vmax.xlane.f32.xlu0 %v4623_v48  ;;  %v1375_v23 = vpop.f32.mrb[25].mxu1  ;;  %v3496_v53 = vpop.f32.mrb[26].mxu0  ;;  %v4637_v48 = vadd.f32 %v1461_v34, %v4461_v6  ;;  %v1464_v62 = vmul.f32 0.125, %v3527_v28 }
 0x182   : > { %v3528_v55 = vpop.f32.mrb[26].mxu1  ;;  %v1153_v15 = vpop.f32.mrb[27].mxu0  ;;  %v1462_v33 = vmul.f32 0.125, %v1375_v23 }
 0x183   : > { %1600 = vmax.xlane.f32.xlu1 %v4629_v8  ;;  %v1378_v47 = vpop.f32.mrb[27].mxu1  ;;  %v1465_v63 = vmul.f32 0.125, %v3528_v55  ;;  %v4656_v28 = vadd.f32 %v1464_v62, %v4499_v41  ;;  %v1444_v62 = vmul.f32 0.125, %v4605_v49  ;;  %v1448_v49 = vmul.f32 0.125, %v4625_v25 }
 0x184   : > { %v1463_v24 = vmul.f32 0.125, %v1378_v47  ;;  %v4665_v55 = vadd.f32 %v1462_v33, %v4527_v60  ;;  %v1445_v33 = vmul.f32 0.125, %v4611_v22 }
 0x185   : > { %1642 = vmax.xlane.f32.xlu0 %v4632_v39  ;;  %v4661_v43 = vadd.f32 %v1465_v63, %v4505_v44 }
 0x186   : > { %v4669_v26 = vadd.f32 %v1463_v24, %v4531_v61  ;;  %v4691_v24 = vadd.f32 %v1444_v62, %v4455_v4 }
 0x187   : > { %1644 = vmax.xlane.f32.xlu1 %v4637_v48  ;;  %v3499_v56 = vpop.f32.mrb[28].mxu0 }
 0x188   : > { %v3531_v29 = vpop.f32.mrb[28].mxu1  ;;  %v1166_v21 = vpop.f32.mrb[29].mxu0 }
 0x189   : > { %1638 = vmax.xlane.f32.xlu0 %v4641_v1  ;;  %v1391_v34 = vpop.f32.mrb[29].mxu1  ;;  %v3500_v8 = vpop.f32.mrb[30].mxu0  ;;  %v1468_v9 = vmul.f32 0.125, %v3531_v29  ;;  %v1450_v4 = vmul.f32 0.125, %v1166_v21 }
 0x18a   : > { %v3532_v45 = vpop.f32.mrb[30].mxu1  ;;  %v1169_v42 = vpop.f32.mrb[31].mxu0  ;;  %v1466_v47 = vmul.f32 0.125, %v1391_v34  ;;  %v1453_v25 = vmul.f32 0.125, %v3500_v8 }
 0x18b   : > { %1640 = vmax.xlane.f32.xlu1 %v4645_v58  ;;  %v1394_v13 = vpop.f32.mrb[31].mxu1  ;;  %v1469_v20 = vmul.f32 0.125, %v3532_v45  ;;  %v4672_v23 = vadd.f32 %v1468_v9, %v4543_v11  ;;  %v1447_v9 = vmul.f32 0.125, %v1153_v15  ;;  %v4707_v15 = vadd.f32 %v1448_v49, %v4499_v41 }
 0x18c   : > { %v1467_v29 = vmul.f32 0.125, %v1394_v13  ;;  %v4682_v45 = vadd.f32 %v1466_v47, %v4571_v31  ;;  %v1446_v13 = vmul.f32 0.125, %v1150_v57  ;;  %v1449_v47 = vmul.f32 0.125, %v3496_v53 }
 0x18d   : > { %1606 = vmax.xlane.f32.xlu0 %v4648_v2  ;;  %v4677_v63 = vadd.f32 %v1469_v20, %v4549_v12  ;;  %v4696_v20 = vadd.f32 %v1445_v33, %v4461_v6  ;;  %v4703_v57 = vadd.f32 %v1447_v9, %v4531_v61  ;;  %v4715_v53 = vadd.f32 %v1450_v4, %v4571_v31 }
 0x18e   : > { %v4687_v34 = vadd.f32 %v1467_v29, %v4575_v30  ;;  %v4699_v22 = vadd.f32 %v1446_v13, %v4527_v60  ;;  %v4711_v6 = vadd.f32 %v1449_v47, %v4505_v44  ;;  %v1452_v60 = vmul.f32 0.125, %v3499_v56 }
 0x18f   : > { %1608 = vmax.xlane.f32.xlu1 %v4653_v38  ;;  %v1451_v61 = vmul.f32 0.125, %v1169_v42  ;;  %v4719_v21 = vadd.f32 %v1453_v25, %v4549_v12 }
 0x190   : > { %v4723_v41 = vadd.f32 %v1452_v60, %v4543_v11 }
 0x191   : > { %1650 = vmax.xlane.f32.xlu0 %v4656_v28  ;;  %v4727_v44 = vadd.f32 %v1451_v61, %v4575_v30 }
 0x193   : > { %1652 = vmax.xlane.f32.xlu1 %v4661_v43 }
 0x195   : > { %1646 = vmax.xlane.f32.xlu0 %v4665_v55 }
 0x197   : > { %1648 = vmax.xlane.f32.xlu1 %v4669_v26 }
 0x199   : > { %1658 = vmax.xlane.f32.xlu0 %v4672_v23 }
 0x19b   : > { %1660 = vmax.xlane.f32.xlu1 %v4677_v63 }
 0x19d   : > { %1654 = vmax.xlane.f32.xlu0 %v4682_v45 }
 0x19f   : > { %1656 = vmax.xlane.f32.xlu1 %v4687_v34 }
 0x1a1   : > { %1610 = vmax.xlane.f32.xlu0 %v4691_v24 }
 0x1a3   : > { %1612 = vmax.xlane.f32.xlu1 %v4696_v20 }
 0x1a5   : > { %1614 = vmax.xlane.f32.xlu0 %v4699_v22 }
 0x1a7   : > { %1616 = vmax.xlane.f32.xlu1 %v4703_v57 }
 0x1a9   : > { %1618 = vmax.xlane.f32.xlu0 %v4707_v15 }
 0x1ab   : > { %1620 = vmax.xlane.f32.xlu1 %v4711_v6 }
 0x1ad   : > { %1622 = vmax.xlane.f32.xlu0 %v4715_v53 }
 0x1af   : > { %1628 = vmax.xlane.f32.xlu1 %v4719_v21 }
 0x1b1   : > { %1626 = vmax.xlane.f32.xlu0 %v4723_v41 }
 0x1b3   : > { %1624 = vmax.xlane.f32.xlu1 %v4727_v44 }
 0x1c1   : > { %v4731_v31 = vpop.xlane.xlu0 %1538 }
 0x1c2   : > { %v1571_v42 = vpop.xlane.xlu1 %1570 }
 0x1c3   : > { %v1680_v12 = vsub.f32 %v4425_v46, %v1571_v42 }
 0x1c5   : > { %v1762_v8 = vmul.f32 1.442695, %v1680_v12  ;;  %v1567_v56 = vpop.xlane.xlu0 %1566 }
 0x1c6   : > { %v1573_v29 = vpop.xlane.xlu1 %1572  ;;  %v1678_v11 = vsub.f32 %v4436_v50, %v1567_v56 }
 0x1c7   : > { %3831 = vpow2.f32 %v1762_v8  ;;  %v1681_v62 = vsub.f32 %v4439_v52, %v1573_v29 }
 0x1c8   : > { %v1758_v33 = vmul.f32 1.442695, %v1678_v11 }
 0x1c9   : > { %v1764_v30 = vmul.f32 1.442695, %v1681_v62  ;;  %v1535_v13 = vpop.xlane.xlu0 %1534 }
 0x1ca   : > { %3833 = vpow2.f32 %v1758_v33  ;;  %v1662_v9 = vsub.f32 %v4444_v59, %v1535_v13  ;;  %v4737_v49 = vpop.xlane.xlu1 %1540  ;;  %v3799_v13 = vld [vmem:[%s4762_s25 + $0x40] sm:$0xff]  }
 0x1cb   : > { %3835 = vpow2.f32 %v1764_v30  ;;  %3565 = vmatprep.subr.bf16.mxu1 %v3799_v13 }
 0x1cc   : > { %v1726_v47 = vmul.f32 1.442695, %v1662_v9  ;;  %3566 = vmatpush3.bf16.msra.mxu1 %v3799_v13 }
 0x1cd   : > { %v1569_v4 = vpop.xlane.xlu0 %1568 }
 0x1ce   : > { %3837 = vpow2.f32 %v1726_v47  ;;  %v1679_v46 = vsub.f32 %v4458_v5, %v1569_v4  ;;  %v1537_v25 = vpop.xlane.xlu1 %1536 }
 0x1cf   : > { %v1663_v50 = vsub.f32 %v4464_v7, %v1537_v25 }
 0x1d0   : > { %v1760_v60 = vmul.f32 1.442695, %v1679_v46 }
 0x1d1   : > { %v4741_v61 = vpop.eup %3831  ;;  %v1728_v52 = vmul.f32 1.442695, %v1663_v50  ;;  %v1579_v42 = vpop.xlane.xlu0 %1578 }
 0x1d2   : > { %3839 = vpow2.f32 %v1760_v60  ;;  %v1684_v12 = vsub.f32 %v4468_v10, %v1579_v42  ;;  %v1581_v59 = vpop.xlane.xlu1 %1580  ;;  %1890 = vadd.xlane.f32.xlu0 %v4741_v61 }
 0x1d3   : > { %v1685_v8 = vsub.f32 %v4472_v14, %v1581_v59  ;;  %3841 = vpow2.f32 %v1728_v52 }
 0x1d4   : > { %v4746_v56 = vpop.eup %3833  ;;  %v1770_v5 = vmul.f32 1.442695, %v1684_v12 }
 0x1d5   : > { %v4748_v29 = vpop.eup %3835  ;;  %v4750_v7 = vpop.xlane.xlu0 %1546  ;;  %v1772_v11 = vmul.f32 1.442695, %v1685_v8  ;;  %v3801_v8 = vld [vmem:[%s4762_s25 + $0x50] sm:$0xff]  }
 0x1d6   : > { %3843 = vpow2.f32 %v1770_v5  ;;  %v4752_v62 = vpop.xlane.xlu1 %1548  ;;  %1886 = vadd.xlane.f32.xlu0 %v4746_v56  ;;  %1892 = vadd.xlane.f32.xlu1 %v4748_v29 }
 0x1d7   : > { %3845 = vpow2.f32 %v1772_v11 }
 0x1d8   : > { %v4756_v10 = vpop.eup %3837 }
 0x1d9   : > { %v1575_v33 = vpop.xlane.xlu0 %1574 }
 0x1da   : > { %v1682_v14 = vsub.f32 %v4491_v32, %v1575_v33  ;;  %v1577_v30 = vpop.xlane.xlu1 %1576  ;;  %1854 = vadd.xlane.f32.xlu0 %v4756_v10  ;;  %v3800_v32 = vld [vmem:[%s4762_s25 + $0x48] sm:$0xff]  }
 0x1db   : > { %v1683_v9 = vsub.f32 %v4494_v37, %v1577_v30  ;;  %3567 = vmatprep.subr.bf16.mxu1 %v3800_v32 }
 0x1dc   : > { %v4768_v47 = vpop.eup %3839  ;;  %v1766_v4 = vmul.f32 1.442695, %v1682_v14  ;;  %3568 = vmatpush3.bf16.msra.mxu1 %v3800_v32 }
 0x1dd   : > { %v1768_v46 = vmul.f32 1.442695, %v1683_v9  ;;  %v4770_v25 = vpop.xlane.xlu0 %1542  ;;  %1888 = vadd.xlane.f32.xlu1 %v4768_v47  ;;  %v4776_v60 = vpop.eup %3841  ;;  %3569 = vmatprep.subr.bf16.mxu1 %v3801_v8 }
 0x1de   : > { %3847 = vpow2.f32 %v1766_v4  ;;  %v4773_v50 = vpop.xlane.xlu1 %1544 }
 0x1df   : > { %3849 = vpow2.f32 %v1768_v46 }
 0x1e0   : > { %v4778_v52 = vpop.eup %3843  ;;  %3570 = vmatpush3.bf16.msra.mxu1 %v3801_v8 }
 0x1e1   : > { %v1587_v37 = vpop.xlane.xlu0 %1586  ;;  %1898 = vadd.xlane.f32.xlu0 %v4778_v52  ;;  %1856 = vadd.xlane.f32.xlu1 %v4776_v60  ;;  %v4785_v5 = vpop.eup %3845 }
 0x1e2   : > { %v1688_v42 = vsub.f32 %v4512_v51, %v1587_v37  ;;  %v1589_v12 = vpop.xlane.xlu1 %1588  ;;  %v3802_v51 = vld [vmem:[%s4762_s25 + $0x58] sm:$0xff]   ;;  %v3803_v37 = vld [vmem:[%s4762_s25 + $0x60] sm:$0xff]  }
 0x1e3   : > { %v1689_v59 = vsub.f32 %v4516_v54, %v1589_v12  ;;  %3571 = vmatprep.subr.bf16.mxu1 %v3802_v51 }
 0x1e4   : > { %v1778_v11 = vmul.f32 1.442695, %v1688_v42  ;;  %3572 = vmatpush3.bf16.msra.mxu1 %v3802_v51 }
 0x1e5   : > { %v1780_v33 = vmul.f32 1.442695, %v1689_v59  ;;  %v4787_v14 = vpop.xlane.xlu0 %1554  ;;  %1900 = vadd.xlane.f32.xlu1 %v4785_v5  ;;  %3573 = vmatprep.subr.bf16.mxu1 %v3803_v37 }
 0x1e6   : > { %3851 = vpow2.f32 %v1778_v11  ;;  %v4790_v30 = vpop.xlane.xlu1 %1556  ;;  %v3804_v11 = vld [vmem:[%s4762_s25 + $0x68] sm:$0xff]  }
 0x1e7   : > { %3853 = vpow2.f32 %v1780_v33 }
 0x1e8   : > { %v4793_v13 = vpop.eup %3847  ;;  %3574 = vmatpush3.bf16.msra.mxu1 %v3803_v37 }
 0x1e9   : > { %v4795_v54 = vpop.eup %3849  ;;  %v1583_v9 = vpop.xlane.xlu0 %1582  ;;  %1894 = vadd.xlane.f32.xlu0 %v4793_v13  ;;  %3575 = vmatprep.subr.bf16.mxu1 %v3804_v11 }
 0x1ea   : > { %5449 = vst [vmem:[#allocation23_spill] sm:$0xff] %v4795_v54  ;;  %v1686_v4 = vsub.f32 %v4535_v0, %v1583_v9  ;;  %v1585_v46 = vpop.xlane.xlu1 %1584  ;;  %1896 = vadd.xlane.f32.xlu1 %v4795_v54 }
 0x1eb   : > { %v1687_v32 = vsub.f32 %v4538_v3, %v1585_v46  ;;  %v3805_v46 = vld [vmem:[%s4762_s25 + $0x70] sm:$0xff]  }
 0x1ec   : > { %v1774_v42 = vmul.f32 1.442695, %v1686_v4  ;;  %3576 = vmatpush3.bf16.msra.mxu1 %v3804_v11 }
 0x1ed   : > { %v1776_v12 = vmul.f32 1.442695, %v1687_v32  ;;  %v4802_v59 = vpop.xlane.xlu0 %1550  ;;  %3577 = vmatprep.subr.bf16.mxu1 %v3805_v46 }
 0x1ee   : > { %3855 = vpow2.f32 %v1774_v42  ;;  %v4804_v8 = vpop.xlane.xlu1 %1552 }
 0x1ef   : > { %3857 = vpow2.f32 %v1776_v12 }
 0x1f0   : > { %v4807_v0 = vpop.eup %3851  ;;  %3578 = vmatpush3.bf16.msra.mxu1 %v3805_v46 }
 0x1f1   : > { %5450 = vst [vmem:[#allocation24_spill] sm:$0xff] %v4807_v0  ;;  %v4809_v33 = vpop.eup %3853  ;;  %v1595_v51 = vpop.xlane.xlu0 %1594  ;;  %1906 = vadd.xlane.f32.xlu0 %v4807_v0  ;;  %v3806_v0 = vld [vmem:[%s4762_s25 + $0x78] sm:$0xff]  }
 0x1f2   : > { %5451 = vst [vmem:[#allocation25_spill] sm:$0xff] %v4809_v33  ;;  %v1692_v3 = vsub.f32 %v4556_v17, %v1595_v51  ;;  %v1597_v9 = vpop.xlane.xlu1 %1596  ;;  %1908 = vadd.xlane.f32.xlu1 %v4809_v33  ;;  %3579 = vmatprep.subr.bf16.mxu1 %v3806_v0 }
 0x1f3   : > { %v1693_v4 = vsub.f32 %v4560_v19, %v1597_v9 }
 0x1f4   : > { %v1786_v32 = vmul.f32 1.442695, %v1692_v3  ;;  %3580 = vmatpush3.bf16.msra.mxu1 %v3806_v0 }
 0x1f5   : > { %v1788_v37 = vmul.f32 1.442695, %v1693_v4  ;;  %v4816_v42 = vpop.xlane.xlu0 %1562 }
 0x1f6   : > { %3859 = vpow2.f32 %v1786_v32  ;;  %v4818_v12 = vpop.xlane.xlu1 %1564 }
 0x1f7   : > { %3861 = vpow2.f32 %v1788_v37 }
 0x1f8   : > { %v4821_v54 = vpop.eup %3855 }
 0x1f9   : > { %5452 = vst [vmem:[#allocation26_spill] sm:$0xff] %v4821_v54  ;;  %v4823_v17 = vpop.eup %3857  ;;  %v1591_v51 = vpop.xlane.xlu0 %1590  ;;  %1902 = vadd.xlane.f32.xlu0 %v4821_v54 }
 0x1fa   : > { %5453 = vst [vmem:[#allocation27_spill] sm:$0xff] %v4823_v17  ;;  %v1690_v19 = vsub.f32 %v4579_v36, %v1591_v51  ;;  %v1593_v11 = vpop.xlane.xlu1 %1592  ;;  %1904 = vadd.xlane.f32.xlu1 %v4823_v17 }
 0x1fb   : > { %v1691_v3 = vsub.f32 %v4582_v40, %v1593_v11 }
 0x1fc   : > { %v1782_v9 = vmul.f32 1.442695, %v1690_v19 }
 0x1fd   : > { %v1784_v4 = vmul.f32 1.442695, %v1691_v3  ;;  %v4829_v46 = vpop.xlane.xlu0 %1558 }
 0x1fe   : > { %3863 = vpow2.f32 %v1782_v9  ;;  %v4833_v37 = vpop.xlane.xlu1 %1560 }
 0x1ff   : > { %3865 = vpow2.f32 %v1784_v4 }
 0x200   : > { %v4831_v32 = vpop.eup %3859 }
 0x201   : > { %5454 = vst [vmem:[#allocation28_spill] sm:$0xff] %v4831_v32  ;;  %v4835_v54 = vpop.eup %3861  ;;  %1914 = vadd.xlane.f32.xlu0 %v4831_v32 }
 0x202   : > { %5455 = vst [vmem:[#allocation29_spill] sm:$0xff] %v4835_v54  ;;  %v1635_v36 = vpop.xlane.xlu0 %1634  ;;  %1916 = vadd.xlane.f32.xlu1 %v4835_v54 }
 0x203   : > { %v1712_v0 = vsub.f32 %v4595_v18, %v1635_v36 }
 0x204   : > { %v1637_v40 = vpop.xlane.xlu1 %1636 }
 0x205   : > { %v1826_v51 = vmul.f32 1.442695, %v1712_v0  ;;  %v1713_v19 = vsub.f32 %v4599_v27, %v1637_v40 }
 0x206   : > { %v4841_v11 = vpop.xlane.xlu0 %1602 }
 0x207   : > { %3867 = vpow2.f32 %v1826_v51  ;;  %v1828_v3 = vmul.f32 1.442695, %v1713_v19 }
 0x208   : > { %v4843_v9 = vpop.eup %3863  ;;  %v4845_v4 = vpop.xlane.xlu1 %1604 }
 0x209   : > { %5456 = vst [vmem:[#allocation30_spill] sm:$0xff] %v4843_v9  ;;  %v4847_v17 = vpop.eup %3865  ;;  %3869 = vpow2.f32 %v1828_v3  ;;  %1910 = vadd.xlane.f32.xlu0 %v4843_v9 }
 0x20a   : > { %5457 = vst [vmem:[#allocation31_spill] sm:$0xff] %v4847_v17  ;;  %v1631_v54 = vpop.xlane.xlu0 %1630  ;;  %1912 = vadd.xlane.f32.xlu1 %v4847_v17 }
 0x20b   : > { %v1710_v18 = vsub.f32 %v4615_v35, %v1631_v54 }
 0x20c   : > { %v1633_v36 = vpop.xlane.xlu1 %1632 }
 0x20d   : > { %v1822_v27 = vmul.f32 1.442695, %v1710_v18  ;;  %v1711_v0 = vsub.f32 %v4619_v16, %v1633_v36 }
 0x20e   : > { %v4853_v40 = vpop.xlane.xlu0 %1598 }
 0x20f   : > { %3871 = vpow2.f32 %v1822_v27  ;;  %v1824_v51 = vmul.f32 1.442695, %v1711_v0 }
 0x210   : > { %v4855_v19 = vpop.xlane.xlu1 %1600 }
 0x211   : > { %v4857_v32 = vpop.eup %3867  ;;  %3873 = vpow2.f32 %v1824_v51  ;;  %v4867_v51 = vld [vmem:[%s4762_s25 + $0xc0] sm:$0xff]  }
 0x212   : > { %5458 = vst [vmem:[#allocation32_spill] sm:$0xff] %v4857_v32  ;;  %v1643_v3 = vpop.xlane.xlu0 %1642  ;;  %1954 = vadd.xlane.f32.xlu0 %v4857_v32  ;;  %3629 = vmatprep.subr.bf16.mxu1 %v4867_v51 }
 0x213   : > { %v4860_v17 = vpop.eup %3869  ;;  %v1716_v35 = vsub.f32 %v4632_v39, %v1643_v3 }
 0x214   : > { %v1645_v54 = vpop.xlane.xlu1 %1644  ;;  %1956 = vadd.xlane.f32.xlu1 %v4860_v17 }
 0x215   : > { %v1834_v16 = vmul.f32 1.442695, %v1716_v35  ;;  %v1717_v18 = vsub.f32 %v4637_v48, %v1645_v54 }
 0x216   : > { %v1639_v36 = vpop.xlane.xlu0 %1638 }
 0x217   : > { %3875 = vpow2.f32 %v1834_v16  ;;  %v1836_v27 = vmul.f32 1.442695, %v1717_v18  ;;  %v1714_v0 = vsub.f32 %v4641_v1, %v1639_v36 }
 0x218   : > { %v1641_v9 = vpop.xlane.xlu1 %1640 }
 0x219   : > { %v4869_v33 = vpop.eup %3871  ;;  %3877 = vpow2.f32 %v1836_v27  ;;  %v1830_v32 = vmul.f32 1.442695, %v1714_v0  ;;  %v1715_v39 = vsub.f32 %v4645_v58, %v1641_v9 }
 0x21a   : > { %v4872_v3 = vpop.xlane.xlu0 %1606  ;;  %1950 = vadd.xlane.f32.xlu0 %v4869_v33 }
 0x21b   : > { %v4876_v48 = vpop.eup %3873  ;;  %3879 = vpow2.f32 %v1830_v32  ;;  %v1832_v35 = vmul.f32 1.442695, %v1715_v39 }
 0x21c   : > { %5459 = vst [vmem:[#allocation33_spill] sm:$0xff] %v4876_v48  ;;  %v4878_v1 = vpop.xlane.xlu1 %1608  ;;  %1952 = vadd.xlane.f32.xlu1 %v4876_v48 }
 0x21d   : > { %3881 = vpow2.f32 %v1832_v35 }
 0x21e   : > { %v1651_v54 = vpop.xlane.xlu0 %1650 }
 0x21f   : > { %v1720_v16 = vsub.f32 %v4656_v28, %v1651_v54 }
 0x220   : > { %v1653_v18 = vpop.xlane.xlu1 %1652 }
 0x221   : > { %v4882_v58 = vpop.eup %3875  ;;  %v1842_v9 = vmul.f32 1.442695, %v1720_v16  ;;  %v1721_v36 = vsub.f32 %v4661_v43, %v1653_v18 }
 0x222   : > { %v1647_v27 = vpop.xlane.xlu0 %1646  ;;  %1962 = vadd.xlane.f32.xlu0 %v4882_v58 }
 0x223   : > { %v4886_v0 = vpop.eup %3877  ;;  %3883 = vpow2.f32 %v1842_v9  ;;  %v1844_v32 = vmul.f32 1.442695, %v1721_v36  ;;  %v1718_v39 = vsub.f32 %v4665_v55, %v1647_v27 }
 0x224   : > { %5460 = vst [vmem:[#allocation34_spill] sm:$0xff] %v4886_v0  ;;  %v1649_v48 = vpop.xlane.xlu1 %1648  ;;  %1964 = vadd.xlane.f32.xlu1 %v4886_v0 }
 0x225   : > { %v4890_v35 = vpop.eup %3879  ;;  %3885 = vpow2.f32 %v1844_v32  ;;  %v1838_v28 = vmul.f32 1.442695, %v1718_v39  ;;  %v1719_v54 = vsub.f32 %v4669_v26, %v1649_v48  ;;  %v5462_v39 = vld [vmem:[#allocation5_spill] sm:$0xff] }
 0x226   : > { %5461 = vst [vmem:[#allocation35_spill] sm:$0xff] %v4890_v35  ;;  %v1659_v16 = vpop.xlane.xlu0 %1658  ;;  %1958 = vadd.xlane.f32.xlu0 %v4890_v35  ;;  %v1664_v26 = vsub.f32 %v5462_v39, %v4731_v31  ;;  %v5464_v31 = vld [vmem:[#allocation9_spill] sm:$0xff] }
 0x227   : > { %v4894_v43 = vpop.eup %3881  ;;  %3887 = vpow2.f32 %v1838_v28  ;;  %v1840_v18 = vmul.f32 1.442695, %v1719_v54  ;;  %v1724_v9 = vsub.f32 %v4672_v23, %v1659_v16  ;;  %v5463_v23 = vld [vmem:[#allocation6_spill] sm:$0xff] }
 0x228   : > { %v1661_v36 = vpop.xlane.xlu1 %1660  ;;  %1960 = vadd.xlane.f32.xlu1 %v4894_v43  ;;  %v1665_v54 = vsub.f32 %v5463_v23, %v4737_v49  ;;  %v5465_v49 = vld [vmem:[#allocation10_spill] sm:$0xff] }
 0x229   : > { %3889 = vpow2.f32 %v1840_v18  ;;  %v1850_v55 = vmul.f32 1.442695, %v1724_v9  ;;  %v1725_v27 = vsub.f32 %v4677_v63, %v1661_v36  ;;  %v1730_v9 = vmul.f32 1.442695, %v1664_v26  ;;  %v5467_v26 = vld [vmem:[#allocation8_spill] sm:$0xff] }
 0x22a   : > { %v1655_v32 = vpop.xlane.xlu0 %1654  ;;  %v1666_v36 = vsub.f32 %v5464_v31, %v4770_v25  ;;  %v5469_v31 = vld [vmem:[#allocation14_spill] sm:$0xff] }
 0x22b   : > { %3891 = vpow2.f32 %v1850_v55  ;;  %v1852_v48 = vmul.f32 1.442695, %v1725_v27  ;;  %v1722_v35 = vsub.f32 %v4682_v45, %v1655_v32  ;;  %v1732_v27 = vmul.f32 1.442695, %v1665_v54 }
 0x22c   : > { %v1657_v0 = vpop.xlane.xlu1 %1656  ;;  %v1734_v25 = vmul.f32 1.442695, %v1666_v36 }
 0x22d   : > { %v4902_v28 = vpop.eup %3883  ;;  %3893 = vpow2.f32 %v1852_v48  ;;  %v1846_v16 = vmul.f32 1.442695, %v1722_v35  ;;  %v1723_v18 = vsub.f32 %v4687_v34, %v1657_v0  ;;  %v1667_v35 = vsub.f32 %v5465_v49, %v4773_v50  ;;  %v5466_v0 = vld [vmem:[#allocation7_spill] sm:$0xff] }
 0x22e   : > { %1970 = vadd.xlane.f32.xlu0 %v4902_v28  ;;  %v1668_v32 = vsub.f32 %v5466_v0, %v4750_v7  ;;  %v1669_v48 = vsub.f32 %v5467_v26, %v4752_v62  ;;  %v1671_v62 = vsub.f32 %v5469_v31, %v4804_v8  ;;  %v5471_v0 = vld [vmem:[#allocation12_spill] sm:$0xff] }
 0x22f   : > { %v4908_v63 = vpop.eup %3885  ;;  %3895 = vpow2.f32 %v1846_v16  ;;  %v1848_v45 = vmul.f32 1.442695, %v1723_v18  ;;  %v1736_v23 = vmul.f32 1.442695, %v1667_v35  ;;  %v5468_v16 = vld [vmem:[#allocation13_spill] sm:$0xff] }
 0x230   : > { %1972 = vadd.xlane.f32.xlu1 %v4908_v63  ;;  %v1738_v54 = vmul.f32 1.442695, %v1668_v32  ;;  %v1670_v7 = vsub.f32 %v5468_v16, %v4802_v59  ;;  %v3815_v59 = vld [vmem:[%s4762_s25] sm:$0xff]   ;;  %v1673_v32 = vsub.f32 %v5471_v0, %v4790_v30  ;;  %v1744_v8 = vmul.f32 1.442695, %v1671_v62  ;;  %v5473_v30 = vld [vmem:[#allocation18_spill] sm:$0xff] }
 0x231   : > { %v4913_v55 = vpop.eup %3887  ;;  %3897 = vpow2.f32 %v1848_v45  ;;  %v5470_v45 = vld [vmem:[#allocation11_spill] sm:$0xff]  ;;  %3533 = vmatprep.subr.bf16.mxu0 %v3815_v59 }
 0x232   : > { %1966 = vadd.xlane.f32.xlu0 %v4913_v55  ;;  %3899 = vpow2.f32 %v1730_v9  ;;  %v1740_v9 = vmul.f32 1.442695, %v1669_v48  ;;  %v1742_v49 = vmul.f32 1.442695, %v1670_v7  ;;  %3534 = vmatpush3.bf16.msra.mxu0 %v3815_v59  ;;  %v1748_v16 = vmul.f32 1.442695, %v1673_v32  ;;  %v4972_v32 = vpop.xlane.xlu1 %1612 }
 0x233   : > { %v4918_v34 = vpop.eup %3889  ;;  %3901 = vpow2.f32 %v1732_v27  ;;  %v1672_v27 = vsub.f32 %v5470_v45, %v4787_v14  ;;  %v5472_v14 = vld [vmem:[#allocation17_spill] sm:$0xff]  ;;  %v1675_v7 = vsub.f32 %v5473_v30, %v4833_v37  ;;  %v4964_v45 = vpop.xlane.xlu0 %1610  ;;  %v5475_v37 = vld [vmem:[#allocation16_spill] sm:$0xff] }
 0x234   : > { %1968 = vadd.xlane.f32.xlu1 %v4918_v34  ;;  %3903 = vpow2.f32 %v1734_v25  ;;  %v1674_v48 = vsub.f32 %v5472_v14, %v4829_v46  ;;  %v5474_v46 = vld [vmem:[#allocation15_spill] sm:$0xff]  ;;  %v1677_v59 = vsub.f32 %v5475_v37, %v4818_v12  ;;  %v3819_v37 = vld [vmem:[%s4762_s25 + $0x20] sm:$0xff]  }
 0x235   : > { %v4923_v39 = vpop.eup %3891  ;;  %3905 = vpow2.f32 %v1736_v23  ;;  %v1746_v26 = vmul.f32 1.442695, %v1672_v27  ;;  %v3816_v23 = vld [vmem:[%s4762_s25 + $0x8] sm:$0xff]   ;;  %v1676_v31 = vsub.f32 %v5474_v46, %v4816_v42  ;;  %v3817_v27 = vld [vmem:[%s4762_s25 + $0x10] sm:$0xff]   ;;  %v1752_v0 = vmul.f32 1.442695, %v1675_v7 }
 0x236   : > { %1978 = vadd.xlane.f32.xlu0 %v4923_v39  ;;  %3907 = vpow2.f32 %v1738_v54  ;;  %3535 = vmatprep.subr.bf16.mxu0 %v3816_v23  ;;  %v1750_v62 = vmul.f32 1.442695, %v1674_v48  ;;  %v3818_v48 = vld [vmem:[%s4762_s25 + $0x18] sm:$0xff]   ;;  %v1756_v12 = vmul.f32 1.442695, %v1677_v59 }
 0x237   : > { %v4928_v50 = vpop.eup %3893  ;;  %3909 = vpow2.f32 %v1740_v9  ;;  %3536 = vmatpush3.bf16.msra.mxu0 %v3816_v23  ;;  %v4985_v7 = vpop.xlane.xlu0 %1614  ;;  %v5479_v59 = vld [vmem:[#allocation20_spill] sm:$0xff] }
 0x238   : > { %1980 = vadd.xlane.f32.xlu1 %v4928_v50  ;;  %3911 = vpow2.f32 %v1742_v49  ;;  %3537 = vmatprep.subr.bf16.mxu0 %v3817_v27 }
 0x239   : > { %v4933_v18 = vpop.eup %3895  ;;  %3913 = vpow2.f32 %v1744_v8  ;;  %v1754_v8 = vmul.f32 1.442695, %v1676_v31 }
 0x23a   : > { %1974 = vadd.xlane.f32.xlu0 %v4933_v18  ;;  %3915 = vpow2.f32 %v1746_v26  ;;  %v5476_v26 = vld [vmem:[#allocation21_spill] sm:$0xff] }
 0x23b   : > { %v4938_v36 = vpop.eup %3897  ;;  %3917 = vpow2.f32 %v1748_v16  ;;  %v1694_v14 = vsub.f32 %v5476_v26, %v4853_v40  ;;  %3538 = vmatpush3.bf16.msra.mxu0 %v3817_v27  ;;  %v5477_v16 = vld [vmem:[#allocation22_spill] sm:$0xff]  ;;  %v5478_v40 = vld [vmem:[#allocation19_spill] sm:$0xff]  ;;  %v4992_v27 = vpop.xlane.xlu1 %1616 }
 0x23c   : > { %1976 = vadd.xlane.f32.xlu1 %v4938_v36  ;;  %v4944_v35 = vpop.eup %3899  ;;  %3919 = vpow2.f32 %v1750_v62  ;;  %v1695_v30 = vsub.f32 %v5477_v16, %v4855_v19  ;;  %3539 = vmatprep.subr.bf16.mxu0 %v3818_v48  ;;  %v1696_v31 = vsub.f32 %v5478_v40, %v4841_v11 }
 0x23d   : > { %v4949_v25 = vpop.eup %3901  ;;  %3921 = vpow2.f32 %v1752_v0  ;;  %v1790_v62 = vmul.f32 1.442695, %v1694_v14  ;;  %v1697_v0 = vsub.f32 %v5479_v59, %v4845_v4  ;;  %v1698_v14 = vsub.f32 %v4648_v2, %v4872_v3 }
 0x23e   : > { %1858 = vadd.xlane.f32.xlu0 %v4944_v35  ;;  %v4955_v54 = vpop.eup %3903  ;;  %3923 = vpow2.f32 %v1754_v8  ;;  %v1792_v26 = vmul.f32 1.442695, %v1695_v30  ;;  %v1794_v11 = vmul.f32 1.442695, %v1696_v31  ;;  %v1699_v30 = vsub.f32 %v4653_v38, %v4878_v1 }
 0x23f   : > { %v4960_v9 = vpop.eup %3905  ;;  %3540 = vmatpush3.bf16.msra.mxu0 %v3818_v48  ;;  %3925 = vpow2.f32 %v1756_v12  ;;  %v1619_v48 = vpop.xlane.xlu0 %1618  ;;  %v3820_v12 = vld [vmem:[%s4762_s25 + $0x28] sm:$0xff]   ;;  %v1796_v4 = vmul.f32 1.442695, %v1697_v0  ;;  %v1798_v2 = vmul.f32 1.442695, %v1698_v14  ;;  %v1700_v3 = vsub.f32 %v4691_v24, %v4964_v45 }
 0x240   : > { %1860 = vadd.xlane.f32.xlu1 %v4949_v25  ;;  %v4968_v49 = vpop.eup %3907  ;;  %3541 = vmatprep.subr.bf16.mxu0 %v3819_v37  ;;  %3927 = vpow2.f32 %v1790_v62  ;;  %v1621_v40 = vpop.xlane.xlu1 %1620  ;;  %v3821_v62 = vld [vmem:[%s4762_s25 + $0x30] sm:$0xff]   ;;  %v1800_v38 = vmul.f32 1.442695, %v1699_v30  ;;  %v1701_v1 = vsub.f32 %v4696_v20, %v4972_v32  ;;  %v1702_v45 = vsub.f32 %v4699_v22, %v4985_v7 }
 0x241   : > { %v4975_v42 = vpop.eup %3909  ;;  %3929 = vpow2.f32 %v1792_v26  ;;  %v1802_v24 = vmul.f32 1.442695, %v1700_v3  ;;  %v1703_v32 = vsub.f32 %v4703_v57, %v4992_v27  ;;  %v1705_v7 = vsub.f32 %v4711_v6, %v1621_v40 }
 0x242   : > { %1862 = vadd.xlane.f32.xlu0 %v4955_v54  ;;  %v4981_v23 = vpop.eup %3911  ;;  %3931 = vpow2.f32 %v1794_v11  ;;  %v3822_v11 = vld [vmem:[%s4762_s25 + $0x38] sm:$0xff]   ;;  %v1804_v20 = vmul.f32 1.442695, %v1701_v1  ;;  %v1806_v22 = vmul.f32 1.442695, %v1702_v45 }
 0x243   : > { %v4988_v46 = vpop.eup %3913  ;;  %3542 = vmatpush3.bf16.msra.mxu0 %v3819_v37  ;;  %3933 = vpow2.f32 %v1796_v4  ;;  %v1623_v59 = vpop.xlane.xlu0 %1622  ;;  %v1808_v57 = vmul.f32 1.442695, %v1703_v32  ;;  %v1812_v6 = vmul.f32 1.442695, %v1705_v7 }
 0x244   : > { %1864 = vadd.xlane.f32.xlu1 %v4960_v9  ;;  %v4996_v19 = vpop.eup %3915  ;;  %3543 = vmatprep.subr.bf16.mxu0 %v3820_v12  ;;  %3935 = vpow2.f32 %v1798_v2  ;;  %v1629_v26 = vpop.xlane.xlu1 %1628  ;;  %v5040_v2 = vld [vmem:[%s4762_s25 + $0x80] sm:$0xff]   ;;  %v1706_v40 = vsub.f32 %v4715_v53, %v1623_v59 }
 0x245   : > { %v5001_v8 = vpop.eup %3917  ;;  %3937 = vpow2.f32 %v1800_v38 }
 0x246   : > { %1866 = vadd.xlane.f32.xlu0 %v4968_v49  ;;  %v5007_v16 = vpop.eup %3919  ;;  %3939 = vpow2.f32 %v1802_v24 }
 0x247   : > { %v5012_v31 = vpop.eup %3921  ;;  %3544 = vmatpush3.bf16.msra.mxu0 %v3820_v12  ;;  %v1704_v12 = vsub.f32 %v4707_v15, %v1619_v48  ;;  %v1627_v30 = vpop.xlane.xlu0 %1626  ;;  %3941 = vpow2.f32 %v1804_v20 }
 0x248   : > { %1868 = vadd.xlane.f32.xlu1 %v4975_v42  ;;  %v5018_v37 = vpop.eup %3923  ;;  %3545 = vmatprep.subr.bf16.mxu0 %v3821_v62  ;;  %v1625_v27 = vpop.xlane.xlu1 %1624  ;;  %3943 = vpow2.f32 %v1806_v22  ;;  %v1708_v24 = vsub.f32 %v4723_v41, %v1627_v30 }
 0x249   : > { %v5023_v0 = vpop.eup %3925  ;;  %v1810_v15 = vmul.f32 1.442695, %v1704_v12  ;;  %v1707_v1 = vsub.f32 %v4727_v44, %v1625_v27  ;;  %v1709_v44 = vsub.f32 %v4719_v21, %v1629_v26 }
 0x24a   : > { %1870 = vadd.xlane.f32.xlu0 %v4981_v23  ;;  %v5029_v14 = vpop.eup %3927  ;;  %v1818_v41 = vmul.f32 1.442695, %v1708_v24 }
 0x24b   : > { %3546 = vmatpush3.bf16.msra.mxu0 %v3821_v62  ;;  %v5035_v4 = vpop.eup %3929  ;;  %v1816_v32 = vmul.f32 1.442695, %v1707_v1  ;;  %v1820_v30 = vmul.f32 1.442695, %v1709_v44 }
 0x24c   : > { %1872 = vadd.xlane.f32.xlu1 %v4988_v46  ;;  %3547 = vmatprep.subr.bf16.mxu0 %v3822_v11  ;;  %v5042_v3 = vpop.eup %3931 }
 0x24d   : > { %v5046_v48 = vpop.eup %3933 }
 0x24e   : > { %1874 = vadd.xlane.f32.xlu0 %v4996_v19  ;;  %v5050_v38 = vpop.eup %3935 }
 0x24f   : > { %3548 = vmatpush3.bf16.msra.mxu0 %v3822_v11  ;;  %v5055_v45 = vpop.eup %3937  ;;  %v1814_v11 = vmul.f32 1.442695, %v1706_v40 }
 0x250   : > { %1876 = vadd.xlane.f32.xlu1 %v5001_v8  ;;  %3597 = vmatprep.subr.bf16.mxu0 %v5040_v2  ;;  %v5059_v20 = vpop.eup %3939 }
 0x251   : > { %v5063_v12 = vpop.eup %3941 }
 0x252   : > { %1878 = vadd.xlane.f32.xlu0 %v5007_v16  ;;  %v5068_v7 = vpop.eup %3943 }
 0x254   : > { %1880 = vadd.xlane.f32.xlu1 %v5012_v31 }
 0x256   : > { %1882 = vadd.xlane.f32.xlu0 %v5018_v37 }
 0x258   : > { %1884 = vadd.xlane.f32.xlu1 %v5023_v0 }
 0x25a   : > { %1918 = vadd.xlane.f32.xlu0 %v5029_v14 }
 0x25c   : > { %1920 = vadd.xlane.f32.xlu1 %v5035_v4 }
 0x25e   : > { %1922 = vadd.xlane.f32.xlu0 %v5042_v3 }
 0x25f   : > { %v1891_v62 = vpop.xlane.xlu0 %1890 }
 0x260   : > { %3945 = vrcp.f32 %v1891_v62  ;;  %1924 = vadd.xlane.f32.xlu1 %v5046_v48 }
 0x261   : > { %3947 = vpow2.f32 %v1808_v57 }
 0x262   : > { %3949 = vpow2.f32 %v1810_v15  ;;  %1926 = vadd.xlane.f32.xlu0 %v5050_v38 }
 0x263   : > { %3951 = vpow2.f32 %v1812_v6  ;;  %v1887_v53 = vpop.xlane.xlu0 %1886  ;;  %v1893_v59 = vpop.xlane.xlu1 %1892 }
 0x264   : > { %3953 = vrcp.f32 %v1887_v53  ;;  %1928 = vadd.xlane.f32.xlu1 %v5055_v45 }
 0x265   : > { %3955 = vrcp.f32 %v1893_v59 }
 0x266   : > { %1930 = vadd.xlane.f32.xlu0 %v5059_v20  ;;  %3957 = vpow2.f32 %v1814_v11 }
 0x267   : > { %v1855_v22 = vpop.xlane.xlu0 %1854 }
 0x268   : > { %3959 = vrcp.f32 %v1855_v22  ;;  %1932 = vadd.xlane.f32.xlu1 %v5063_v12 }
 0x269   : > { %3961 = vpow2.f32 %v1816_v32 }
 0x26a   : > { %v3946_v57 = vpop.eup %3945  ;;  %3963 = vpow2.f32 %v1818_v41  ;;  %1934 = vadd.xlane.f32.xlu0 %v5068_v7  ;;  %v1889_v21 = vpop.xlane.xlu1 %1888 }
 0x26b   : > { %v5071_v26 = vpop.eup %3947  ;;  %v2064_v15 = vmul.f32 %v3946_v57, %v4741_v61  ;;  %3965 = vrcp.f32 %v1889_v21 }
 0x26c   : > { %v5074_v27 = vpop.eup %3949  ;;  %1936 = vadd.xlane.f32.xlu1 %v5071_v26  ;;  %3967 = vpow2.f32 %v1820_v30 }
 0x26d   : > { %v5077_v6 = vpop.eup %3951  ;;  %2128 = vst [vmem:[%s5079_s7 + $0x90] sm:$0xff] %v2064_v15 }
 0x26e   : > { %v3954_v40 = vpop.eup %3953  ;;  %1938 = vadd.xlane.f32.xlu0 %v5074_v27  ;;  %v1899_v62 = vpop.xlane.xlu0 %1898 }
 0x26f   : > { %v1857_v1 = vpop.xlane.xlu1 %1856  ;;  %v3956_v61 = vpop.eup %3955  ;;  %3969 = vrcp.f32 %v1899_v62  ;;  %v2062_v24 = vmul.f32 %v3954_v40, %v4746_v56 }
 0x270   : > { %v2065_v11 = vmul.f32 %v3956_v61, %v4748_v29  ;;  %3971 = vrcp.f32 %v1857_v1  ;;  %1940 = vadd.xlane.f32.xlu1 %v5077_v6  ;;  %v5086_v53 = vpop.eup %3957  ;;  %v3808_v1 = vld [vmem:[%s4762_s25 + $0xc8] sm:$0xff]  }
 0x271   : > { %2126 = vst [vmem:[%s5079_s7 + $0x80] sm:$0xff] %v2062_v24 }
 0x272   : > { %v3960_v59 = vpop.eup %3959  ;;  %2129 = vst [vmem:[%s5079_s7 + $0x98] sm:$0xff] %v2065_v11  ;;  %1942 = vadd.xlane.f32.xlu0 %v5086_v53  ;;  %v2183_v62 = vpack.c.bf16 %v2065_v11, %v2064_v15 }
 0x273   : > { %v1901_v44 = vpop.xlane.xlu1 %1900  ;;  %v5091_v32 = vpop.eup %3961  ;;  %v2046_v56 = vmul.f32 %v3960_v59, %v4756_v10 }
 0x274   : > { %3973 = vrcp.f32 %v1901_v44  ;;  %v5094_v41 = vpop.eup %3963  ;;  %1944 = vadd.xlane.f32.xlu1 %v5091_v32 }
 0x275   : > { %v3966_v29 = vpop.eup %3965  ;;  %2110 = vst [vmem:[%s5079_s7] sm:$0xff] %v2046_v56 }
 0x276   : > { %1946 = vadd.xlane.f32.xlu0 %v5094_v41  ;;  %v1895_v22 = vpop.xlane.xlu0 %1894  ;;  %v2063_v30 = vmul.f32 %v3966_v29, %v4768_v47  ;;  %v5100_v57 = vpop.eup %3967 }
 0x277   : > { %3975 = vrcp.f32 %v1895_v22  ;;  %v1897_v21 = vpop.xlane.xlu1 %1896 }
 0x278   : > { %3977 = vrcp.f32 %v1897_v21  ;;  %1948 = vadd.xlane.f32.xlu1 %v5100_v57  ;;  %2127 = vst [vmem:[%s5079_s7 + $0x88] sm:$0xff] %v2063_v30  ;;  %v2182_v10 = vpack.c.bf16 %v2063_v30, %v2062_v24  ;;  %v3809_v24 = vld [vmem:[%s4762_s25 + $0xd0] sm:$0xff]  }
 0x279   : > { %v3970_v40 = vpop.eup %3969  ;;  %v5480_v30 = vld [vmem:[#allocation23_spill] sm:$0xff] }
 0x27a   : > { %v3972_v61 = vpop.eup %3971  ;;  %3581 = vmatprep.mubr.bf16.mxu1 %v2182_v10  ;;  %v2068_v59 = vmul.f32 %v3970_v40, %v4778_v52 }
 0x27b   : > { %3582 = vmatmul.mubr.bf16.vlgmr.msra.gmra.mrb[32].mxu1 %v2183_v62  ;;  %v2047_v47 = vmul.f32 %v3972_v61, %v4776_v60  ;;  %v3811_v62 = vld [vmem:[%s4762_s25 + $0xe0] sm:$0xff]  }
 0x27c   : > { %2132 = vst [vmem:[%s5079_s7 + $0xb0] sm:$0xff] %v2068_v59  ;;  %3630 = vmatpush3.bf16.msra.mxu1 %v4867_v51  ;;  %v3810_v51 = vld [vmem:[%s4762_s25 + $0xd8] sm:$0xff]  }
 0x27d   : > { %2111 = vst [vmem:[%s5079_s7 + $0x8] sm:$0xff] %v2047_v47  ;;  %v2174_v29 = vpack.c.bf16 %v2047_v47, %v2046_v56  ;;  %3631 = vmatprep.subr.bf16.mxu1 %v3808_v1  ;;  %v5481_v47 = vld [vmem:[#allocation24_spill] sm:$0xff] }
 0x27e   : > { %v3974_v44 = vpop.eup %3973  ;;  %v1907_v15 = vpop.xlane.xlu0 %1906 }
 0x27f   : > { %v2069_v11 = vmul.f32 %v3974_v44, %v4785_v5  ;;  %3979 = vrcp.f32 %v1907_v15  ;;  %3549 = vmatprep.mubr.bf16.mxu0 %v2174_v29  ;;  %v1909_v52 = vpop.xlane.xlu1 %1908  ;;  %v3812_v29 = vld [vmem:[%s4762_s25 + $0xe8] sm:$0xff]  }
 0x280   : > { %3981 = vrcp.f32 %v1909_v52  ;;  %3632 = vmatpush3.bf16.msra.mxu1 %v3808_v1 }
 0x281   : > { %2133 = vst [vmem:[%s5079_s7 + $0xb8] sm:$0xff] %v2069_v11  ;;  %v3976_v60 = vpop.eup %3975  ;;  %3633 = vmatprep.subr.bf16.mxu1 %v3809_v24  ;;  %v2185_v40 = vpack.c.bf16 %v2069_v11, %v2068_v59  ;;  %v3813_v11 = vld [vmem:[%s4762_s25 + $0xf0] sm:$0xff]  }
 0x282   : > { %v3978_v22 = vpop.eup %3977  ;;  %v2066_v56 = vmul.f32 %v3976_v60, %v4793_v13 }
 0x283   : > { %v2067_v21 = vmul.f32 %v3978_v22, %v5480_v30  ;;  %v5483_v22 = vld [vmem:[#allocation26_spill] sm:$0xff]  ;;  %v3814_v30 = vld [vmem:[%s4762_s25 + $0xf8] sm:$0xff]  }
 0x284   : > { %2130 = vst [vmem:[%s5079_s7 + $0xa0] sm:$0xff] %v2066_v56  ;;  %3634 = vmatpush3.bf16.msra.mxu1 %v3809_v24  ;;  %v5482_v24 = vld [vmem:[#allocation25_spill] sm:$0xff] }
 0x285   : > { %2131 = vst [vmem:[%s5079_s7 + $0xa8] sm:$0xff] %v2067_v21  ;;  %v2184_v5 = vpack.c.bf16 %v2067_v21, %v2066_v56  ;;  %3635 = vmatprep.subr.bf16.mxu1 %v3810_v51  ;;  %v5484_v21 = vld [vmem:[#allocation27_spill] sm:$0xff] }
 0x286   : > { %v1903_v10 = vpop.xlane.xlu0 %1902 }
 0x287   : > { %3983 = vrcp.f32 %v1903_v10  ;;  %3585 = vmatprep.mubr.bf16.mxu1 %v2184_v5  ;;  %v1905_v1 = vpop.xlane.xlu1 %1904 }
 0x288   : > { %3985 = vrcp.f32 %v1905_v1  ;;  %3586 = vmatmul.mubr.bf16.gmra.mrb[36].mxu1 %v2185_v40 }
 0x289   : > { %v3980_v13 = vpop.eup %3979  ;;  %3636 = vmatpush3.bf16.msra.mxu1 %v3810_v51 }
 0x28a   : > { %v3982_v61 = vpop.eup %3981  ;;  %v2072_v44 = vmul.f32 %v3980_v13, %v5481_v47  ;;  %3637 = vmatprep.subr.bf16.mxu1 %v3811_v62  ;;  %v5485_v47 = vld [vmem:[#allocation28_spill] sm:$0xff] }
 0x28b   : > { %v2073_v15 = vmul.f32 %v3982_v61, %v5482_v24  ;;  %v5486_v24 = vld [vmem:[#allocation29_spill] sm:$0xff] }
 0x28c   : > { %2136 = vst [vmem:[%s5079_s7 + $0xd0] sm:$0xff] %v2072_v44 }
 0x28d   : > { %2137 = vst [vmem:[%s5079_s7 + $0xd8] sm:$0xff] %v2073_v15  ;;  %3638 = vmatpush3.bf16.msra.mxu1 %v3811_v62  ;;  %v2187_v62 = vpack.c.bf16 %v2073_v15, %v2072_v44 }
 0x28e   : > { %v1915_v59 = vpop.xlane.xlu0 %1914  ;;  %3639 = vmatprep.subr.bf16.mxu1 %v3812_v29 }
 0x28f   : > { %3987 = vrcp.f32 %v1915_v59  ;;  %v1917_v52 = vpop.xlane.xlu1 %1916 }
 0x290   : > { %3989 = vrcp.f32 %v1917_v52 }
 0x291   : > { %v3984_v60 = vpop.eup %3983  ;;  %3640 = vmatpush3.bf16.msra.mxu1 %v3812_v29 }
 0x292   : > { %v3986_v51 = vpop.eup %3985  ;;  %v2070_v56 = vmul.f32 %v3984_v60, %v5483_v22  ;;  %3641 = vmatprep.subr.bf16.mxu1 %v3813_v11  ;;  %v5487_v60 = vld [vmem:[#allocation30_spill] sm:$0xff]  ;;  %v5488_v22 = vld [vmem:[#allocation31_spill] sm:$0xff] }
 0x293   : > { %v2071_v5 = vmul.f32 %v3986_v51, %v5484_v21 }
 0x294   : > { %2134 = vst [vmem:[%s5079_s7 + $0xc0] sm:$0xff] %v2070_v56 }
 0x295   : > { %2135 = vst [vmem:[%s5079_s7 + $0xc8] sm:$0xff] %v2071_v5  ;;  %v2186_v10 = vpack.c.bf16 %v2071_v5, %v2070_v56  ;;  %3642 = vmatpush3.bf16.msra.mxu1 %v3813_v11 }
 0x296   : > { %v1911_v40 = vpop.xlane.xlu0 %1910  ;;  %3643 = vmatprep.subr.bf16.mxu1 %v3814_v30 }
 0x297   : > { %3991 = vrcp.f32 %v1911_v40  ;;  %3589 = vmatprep.mubr.bf16.mxu1 %v2186_v10  ;;  %v1913_v1 = vpop.xlane.xlu1 %1912 }
 0x298   : > { %3993 = vrcp.f32 %v1913_v1  ;;  %3590 = vmatmul.mubr.bf16.gmra.mrb[40].mxu1 %v2187_v62  ;;  %v5489_v62 = vld [vmem:[#allocation32_spill] sm:$0xff] }
 0x299   : > { %v3988_v13 = vpop.eup %3987  ;;  %3644 = vmatpush3.bf16.msra.mxu1 %v3814_v30 }
 0x29a   : > { %v3990_v61 = vpop.eup %3989  ;;  %v2076_v29 = vmul.f32 %v3988_v13, %v5485_v47 }
 0x29b   : > { %v2077_v59 = vmul.f32 %v3990_v61, %v5486_v24 }
 0x29c   : > { %2140 = vst [vmem:[%s5079_s7 + $0xf0] sm:$0xff] %v2076_v29 }
 0x29d   : > { %2141 = vst [vmem:[%s5079_s7 + $0xf8] sm:$0xff] %v2077_v59  ;;  %v2189_v21 = vpack.c.bf16 %v2077_v59, %v2076_v29 }
 0x29f   : > { %v1955_v11 = vpop.xlane.xlu0 %1954 }
 0x2a0   : > { %3995 = vrcp.f32 %v1955_v11 }
 0x2a1   : > { %v3992_v44 = vpop.eup %3991  ;;  %v1957_v15 = vpop.xlane.xlu1 %1956 }
 0x2a2   : > { %v3994_v52 = vpop.eup %3993  ;;  %3997 = vrcp.f32 %v1957_v15  ;;  %v2074_v51 = vmul.f32 %v3992_v44, %v5487_v60 }
 0x2a3   : > { %v2075_v56 = vmul.f32 %v3994_v52, %v5488_v22  ;;  %v5490_v52 = vld [vmem:[#allocation33_spill] sm:$0xff] }
 0x2a4   : > { %2138 = vst [vmem:[%s5079_s7 + $0xe0] sm:$0xff] %v2074_v51 }
 0x2a5   : > { %2139 = vst [vmem:[%s5079_s7 + $0xe8] sm:$0xff] %v2075_v56  ;;  %v2188_v30 = vpack.c.bf16 %v2075_v56, %v2074_v51 }
 0x2a7   : > { %v1951_v5 = vpop.xlane.xlu0 %1950  ;;  %3593 = vmatprep.mubr.bf16.mxu1 %v2188_v30 }
 0x2a8   : > { %3999 = vrcp.f32 %v1951_v5  ;;  %3594 = vmatmul.mubr.bf16.gmra.mrb[44].mxu1 %v2189_v21  ;;  %v5491_v5 = vld [vmem:[#allocation34_spill] sm:$0xff] }
 0x2a9   : > { %v1953_v10 = vpop.xlane.xlu1 %1952 }
 0x2aa   : > { %v3996_v40 = vpop.eup %3995  ;;  %4001 = vrcp.f32 %v1953_v10 }
 0x2ab   : > { %v2096_v1 = vmul.f32 %v3996_v40, %v5489_v62 }
 0x2ac   : > { %v3998_v13 = vpop.eup %3997 }
 0x2ad   : > { %2160 = vst [vmem:[%s5079_s7 + $0x190] sm:$0xff] %v2096_v1  ;;  %v2097_v61 = vmul.f32 %v3998_v13, %v4860_v17  ;;  %v5492_v13 = vld [vmem:[#allocation35_spill] sm:$0xff] }
 0x2af   : > { %2161 = vst [vmem:[%s5079_s7 + $0x198] sm:$0xff] %v2097_v61  ;;  %v1963_v47 = vpop.xlane.xlu0 %1962  ;;  %v2199_v17 = vpack.c.bf16 %v2097_v61, %v2096_v1 }
 0x2b0   : > { %4003 = vrcp.f32 %v1963_v47 }
 0x2b1   : > { %v1965_v24 = vpop.xlane.xlu1 %1964 }
 0x2b2   : > { %v4000_v29 = vpop.eup %3999  ;;  %4005 = vrcp.f32 %v1965_v24 }
 0x2b3   : > { %v1959_v59 = vpop.xlane.xlu0 %1958  ;;  %v2094_v11 = vmul.f32 %v4000_v29, %v4869_v33 }
 0x2b4   : > { %v4002_v44 = vpop.eup %4001  ;;  %4007 = vrcp.f32 %v1959_v59 }
 0x2b5   : > { %v1961_v15 = vpop.xlane.xlu1 %1960  ;;  %v2095_v60 = vmul.f32 %v4002_v44, %v5490_v52  ;;  %2158 = vst [vmem:[%s5079_s7 + $0x180] sm:$0xff] %v2094_v11 }
 0x2b6   : > { %4009 = vrcp.f32 %v1961_v15 }
 0x2b7   : > { %2159 = vst [vmem:[%s5079_s7 + $0x188] sm:$0xff] %v2095_v60  ;;  %v2198_v51 = vpack.c.bf16 %v2095_v60, %v2094_v11 }
 0x2b9   : > { %3645 = vmatprep.mubr.bf16.mxu1 %v2198_v51 }
 0x2ba   : > { %v4004_v22 = vpop.eup %4003  ;;  %3646 = vmatmul.mubr.bf16.vlgmr.msra.gmra.mrb[48].mxu1 %v2199_v17 }
 0x2bb   : > { %v1971_v56 = vpop.xlane.xlu0 %1970  ;;  %v2100_v30 = vmul.f32 %v4004_v22, %v4882_v58 }
 0x2bc   : > { %v4006_v33 = vpop.eup %4005  ;;  %4011 = vrcp.f32 %v1971_v56 }
 0x2bd   : > { %v1973_v21 = vpop.xlane.xlu1 %1972  ;;  %v2101_v10 = vmul.f32 %v4006_v33, %v5491_v5  ;;  %2164 = vst [vmem:[%s5079_s7 + $0x1b0] sm:$0xff] %v2100_v30 }
 0x2be   : > { %v4008_v40 = vpop.eup %4007  ;;  %4013 = vrcp.f32 %v1973_v21 }
 0x2bf   : > { %v1967_v62 = vpop.xlane.xlu0 %1966  ;;  %v2098_v47 = vmul.f32 %v4008_v40, %v5492_v13  ;;  %2165 = vst [vmem:[%s5079_s7 + $0x1b8] sm:$0xff] %v2101_v10  ;;  %v2201_v59 = vpack.c.bf16 %v2101_v10, %v2100_v30 }
 0x2c0   : > { %v4010_v1 = vpop.eup %4009  ;;  %4015 = vrcp.f32 %v1967_v62 }
 0x2c1   : > { %v1969_v61 = vpop.xlane.xlu1 %1968  ;;  %v2099_v24 = vmul.f32 %v4010_v1, %v4894_v43  ;;  %2162 = vst [vmem:[%s5079_s7 + $0x1a0] sm:$0xff] %v2098_v47 }
 0x2c2   : > { %4017 = vrcp.f32 %v1969_v61 }
 0x2c3   : > { %v1979_v58 = vpop.xlane.xlu0 %1978  ;;  %2163 = vst [vmem:[%s5079_s7 + $0x1a8] sm:$0xff] %v2099_v24  ;;  %v2200_v29 = vpack.c.bf16 %v2099_v24, %v2098_v47 }
 0x2c4   : > { %4019 = vrcp.f32 %v1979_v58 }
 0x2c5   : > { %3649 = vmatprep.mubr.bf16.mxu1 %v2200_v29  ;;  %v1981_v11 = vpop.xlane.xlu1 %1980 }
 0x2c6   : > { %v4012_v44 = vpop.eup %4011  ;;  %4021 = vrcp.f32 %v1981_v11  ;;  %3650 = vmatmul.mubr.bf16.gmra.mrb[52].mxu1 %v2201_v59 }
 0x2c7   : > { %v1975_v15 = vpop.xlane.xlu0 %1974  ;;  %v2104_v52 = vmul.f32 %v4012_v44, %v4902_v28 }
 0x2c8   : > { %v4014_v60 = vpop.eup %4013  ;;  %4023 = vrcp.f32 %v1975_v15 }
 0x2c9   : > { %v1977_v43 = vpop.xlane.xlu1 %1976  ;;  %v2105_v51 = vmul.f32 %v4014_v60, %v4908_v63  ;;  %2168 = vst [vmem:[%s5079_s7 + $0x1d0] sm:$0xff] %v2104_v52 }
 0x2ca   : > { %v4016_v17 = vpop.eup %4015  ;;  %4025 = vrcp.f32 %v1977_v43  ;;  %v3824_v43 = vld [vmem:[%s4762_s25 + $0x88] sm:$0xff]  }
 0x2cb   : > { %v1859_v22 = vpop.xlane.xlu0 %1858  ;;  %v2102_v56 = vmul.f32 %v4016_v17, %v4913_v55  ;;  %2169 = vst [vmem:[%s5079_s7 + $0x1d8] sm:$0xff] %v2105_v51  ;;  %v2203_v55 = vpack.c.bf16 %v2105_v51, %v2104_v52 }
 0x2cc   : > { %v4018_v30 = vpop.eup %4017  ;;  %4027 = vrcp.f32 %v1859_v22 }
 0x2cd   : > { %v1861_v33 = vpop.xlane.xlu1 %1860  ;;  %v2103_v21 = vmul.f32 %v4018_v30, %v4918_v34  ;;  %2166 = vst [vmem:[%s5079_s7 + $0x1c0] sm:$0xff] %v2102_v56 }
 0x2ce   : > { %v4020_v28 = vpop.eup %4019  ;;  %4029 = vrcp.f32 %v1861_v33  ;;  %v3825_v33 = vld [vmem:[%s4762_s25 + $0x90] sm:$0xff]  }
 0x2cf   : > { %v1863_v5 = vpop.xlane.xlu0 %1862  ;;  %2167 = vst [vmem:[%s5079_s7 + $0x1c8] sm:$0xff] %v2103_v21  ;;  %v2202_v63 = vpack.c.bf16 %v2103_v21, %v2102_v56  ;;  %v2108_v10 = vmul.f32 %v4020_v28, %v4923_v39 }
 0x2d0   : > { %v4022_v40 = vpop.eup %4021  ;;  %4031 = vrcp.f32 %v1863_v5 }
 0x2d1   : > { %3653 = vmatprep.mubr.bf16.mxu1 %v2202_v63  ;;  %v1865_v62 = vpop.xlane.xlu1 %1864  ;;  %v2109_v13 = vmul.f32 %v4022_v40, %v4928_v50  ;;  %2172 = vst [vmem:[%s5079_s7 + $0x1f0] sm:$0xff] %v2108_v10 }
 0x2d2   : > { %v4024_v34 = vpop.eup %4023  ;;  %4033 = vrcp.f32 %v1865_v62  ;;  %3654 = vmatmul.mubr.bf16.gmra.mrb[56].mxu1 %v2203_v55 }
 0x2d3   : > { %v1867_v47 = vpop.xlane.xlu0 %1866  ;;  %v2106_v1 = vmul.f32 %v4024_v34, %v4933_v18  ;;  %2173 = vst [vmem:[%s5079_s7 + $0x1f8] sm:$0xff] %v2109_v13  ;;  %v2205_v18 = vpack.c.bf16 %v2109_v13, %v2108_v10  ;;  %v3826_v10 = vld [vmem:[%s4762_s25 + $0x98] sm:$0xff]  }
 0x2d4   : > { %v4026_v61 = vpop.eup %4025  ;;  %4035 = vrcp.f32 %v1867_v47  ;;  %v3827_v47 = vld [vmem:[%s4762_s25 + $0xa0] sm:$0xff]  }
 0x2d5   : > { %v1869_v39 = vpop.xlane.xlu1 %1868  ;;  %v2107_v24 = vmul.f32 %v4026_v61, %v4938_v36  ;;  %2170 = vst [vmem:[%s5079_s7 + $0x1e0] sm:$0xff] %v2106_v1 }
 0x2d6   : > { %v4028_v58 = vpop.eup %4027  ;;  %4037 = vrcp.f32 %v1869_v39 }
 0x2d7   : > { %v2048_v50 = vmul.f32 %v4028_v58, %v4944_v35  ;;  %v1871_v29 = vpop.xlane.xlu0 %1870  ;;  %2171 = vst [vmem:[%s5079_s7 + $0x1e8] sm:$0xff] %v2107_v24  ;;  %v2204_v59 = vpack.c.bf16 %v2107_v24, %v2106_v1 }
 0x2d8   : > { %v4030_v11 = vpop.eup %4029  ;;  %4039 = vrcp.f32 %v1871_v29 }
 0x2d9   : > { %2112 = vst [vmem:[%s5079_s7 + $0x10] sm:$0xff] %v2048_v50  ;;  %v2049_v44 = vmul.f32 %v4030_v11, %v4949_v25  ;;  %3657 = vmatprep.mubr.bf16.mxu1 %v2204_v59  ;;  %v1873_v15 = vpop.xlane.xlu1 %1872 }
 0x2da   : > { %v4032_v36 = vpop.eup %4031  ;;  %4041 = vrcp.f32 %v1873_v15  ;;  %3658 = vmatmul.mubr.bf16.gmra.mrb[60].mxu1 %v2205_v18  ;;  %v3829_v15 = vld [vmem:[%s4762_s25 + $0xb0] sm:$0xff]  }
 0x2db   : > { %2113 = vst [vmem:[%s5079_s7 + $0x18] sm:$0xff] %v2049_v44  ;;  %v1875_v52 = vpop.xlane.xlu0 %1874  ;;  %v2175_v35 = vpack.c.bf16 %v2049_v44, %v2048_v50  ;;  %v2050_v60 = vmul.f32 %v4032_v36, %v4955_v54  ;;  %v3828_v50 = vld [vmem:[%s4762_s25 + $0xa8] sm:$0xff]  }
 0x2dc   : > { %v4034_v51 = vpop.eup %4033  ;;  %4043 = vrcp.f32 %v1875_v52 }
 0x2dd   : > { %3550 = vmatmul.mubr.bf16.vlgmr.msra.gmra.mrb[32].mxu0 %v2175_v35  ;;  %v1877_v17 = vpop.xlane.xlu1 %1876  ;;  %v2051_v25 = vmul.f32 %v4034_v51, %v4960_v9  ;;  %2114 = vst [vmem:[%s5079_s7 + $0x20] sm:$0xff] %v2050_v60  ;;  %v3830_v51 = vld [vmem:[%s4762_s25 + $0xb8] sm:$0xff]  }
 0x2de   : > { %v4036_v22 = vpop.eup %4035  ;;  %4045 = vrcp.f32 %v1877_v17  ;;  %3598 = vmatpush3.bf16.msra.mxu0 %v5040_v2 }
 0x2df   : > { %v1879_v56 = vpop.xlane.xlu0 %1878  ;;  %2115 = vst [vmem:[%s5079_s7 + $0x28] sm:$0xff] %v2051_v25  ;;  %v2176_v30 = vpack.c.bf16 %v2051_v25, %v2050_v60  ;;  %3599 = vmatprep.subr.bf16.mxu0 %v3824_v43  ;;  %v2052_v54 = vmul.f32 %v4036_v22, %v4968_v49 }
 0x2e0   : > { %v4038_v21 = vpop.eup %4037  ;;  %4047 = vrcp.f32 %v1879_v56 }
 0x2e1   : > { %3553 = vmatprep.mubr.bf16.mxu0 %v2176_v30  ;;  %v1881_v28 = vpop.xlane.xlu1 %1880  ;;  %v2053_v9 = vmul.f32 %v4038_v21, %v4975_v42  ;;  %2116 = vst [vmem:[%s5079_s7 + $0x30] sm:$0xff] %v2052_v54 }
 0x2e2   : > { %v4040_v5 = vpop.eup %4039  ;;  %4049 = vrcp.f32 %v1881_v28  ;;  %3600 = vmatpush3.bf16.msra.mxu0 %v3824_v43 }
 0x2e3   : > { %v1883_v2 = vpop.xlane.xlu0 %1882  ;;  %2117 = vst [vmem:[%s5079_s7 + $0x38] sm:$0xff] %v2053_v9  ;;  %v2177_v63 = vpack.c.bf16 %v2053_v9, %v2052_v54  ;;  %3601 = vmatprep.subr.bf16.mxu0 %v3825_v33  ;;  %v2054_v49 = vmul.f32 %v4040_v5, %v4981_v23 }
 0x2e4   : > { %v4042_v40 = vpop.eup %4041  ;;  %4051 = vrcp.f32 %v1883_v2 }
 0x2e5   : > { %3554 = vmatmul.mubr.bf16.gmra.mrb[36].mxu0 %v2177_v63  ;;  %v1885_v55 = vpop.xlane.xlu1 %1884  ;;  %v2055_v42 = vmul.f32 %v4042_v40, %v4988_v46  ;;  %2118 = vst [vmem:[%s5079_s7 + $0x40] sm:$0xff] %v2054_v49 }
 0x2e6   : > { %v4044_v62 = vpop.eup %4043  ;;  %4053 = vrcp.f32 %v1885_v55  ;;  %3602 = vmatpush3.bf16.msra.mxu0 %v3825_v33 }
 0x2e7   : > { %v1919_v13 = vpop.xlane.xlu0 %1918  ;;  %2119 = vst [vmem:[%s5079_s7 + $0x48] sm:$0xff] %v2055_v42  ;;  %v2178_v34 = vpack.c.bf16 %v2055_v42, %v2054_v49  ;;  %3603 = vmatprep.subr.bf16.mxu0 %v3826_v10  ;;  %v2056_v23 = vmul.f32 %v4044_v62, %v4996_v19 }
 0x2e8   : > { %v4046_v1 = vpop.eup %4045  ;;  %4055 = vrcp.f32 %v1919_v13 }
 0x2e9   : > { %3557 = vmatprep.mubr.bf16.mxu0 %v2178_v34  ;;  %v1921_v61 = vpop.xlane.xlu1 %1920  ;;  %v2057_v46 = vmul.f32 %v4046_v1, %v5001_v8  ;;  %2120 = vst [vmem:[%s5079_s7 + $0x50] sm:$0xff] %v2056_v23 }
 0x2ea   : > { %v4048_v39 = vpop.eup %4047  ;;  %4057 = vrcp.f32 %v1921_v61  ;;  %3604 = vmatpush3.bf16.msra.mxu0 %v3826_v10 }
 0x2eb   : > { %v1923_v24 = vpop.xlane.xlu0 %1922  ;;  %2121 = vst [vmem:[%s5079_s7 + $0x58] sm:$0xff] %v2057_v46  ;;  %v2179_v58 = vpack.c.bf16 %v2057_v46, %v2056_v23  ;;  %3605 = vmatprep.subr.bf16.mxu0 %v3827_v47  ;;  %v2058_v19 = vmul.f32 %v4048_v39, %v5007_v16 }
 0x2ec   : > { %v4050_v29 = vpop.eup %4049  ;;  %4059 = vrcp.f32 %v1923_v24 }
 0x2ed   : > { %3558 = vmatmul.mubr.bf16.gmra.mrb[40].mxu0 %v2179_v58  ;;  %v1925_v59 = vpop.xlane.xlu1 %1924  ;;  %v2059_v8 = vmul.f32 %v4050_v29, %v5012_v31  ;;  %2122 = vst [vmem:[%s5079_s7 + $0x60] sm:$0xff] %v2058_v19 }
 0x2ee   : > { %v4052_v11 = vpop.eup %4051  ;;  %4061 = vrcp.f32 %v1925_v59  ;;  %3606 = vmatpush3.bf16.msra.mxu0 %v3827_v47 }
 0x2ef   : > { %v1927_v18 = vpop.xlane.xlu0 %1926  ;;  %2123 = vst [vmem:[%s5079_s7 + $0x68] sm:$0xff] %v2059_v8  ;;  %v2180_v44 = vpack.c.bf16 %v2059_v8, %v2058_v19  ;;  %3607 = vmatprep.subr.bf16.mxu0 %v3828_v50  ;;  %v2060_v16 = vmul.f32 %v4052_v11, %v5018_v37 }
 0x2f0   : > { %v4054_v36 = vpop.eup %4053  ;;  %4063 = vrcp.f32 %v1927_v18 }
 0x2f1   : > { %3561 = vmatprep.mubr.bf16.mxu0 %v2180_v44  ;;  %v1929_v52 = vpop.xlane.xlu1 %1928  ;;  %v2061_v31 = vmul.f32 %v4054_v36, %v5023_v0  ;;  %2124 = vst [vmem:[%s5079_s7 + $0x70] sm:$0xff] %v2060_v16 }
 0x2f2   : > { %v4056_v35 = vpop.eup %4055  ;;  %4065 = vrcp.f32 %v1929_v52  ;;  %3608 = vmatpush3.bf16.msra.mxu0 %v3828_v50 }
 0x2f3   : > { %v1931_v60 = vpop.xlane.xlu0 %1930  ;;  %2125 = vst [vmem:[%s5079_s7 + $0x78] sm:$0xff] %v2061_v31  ;;  %v2181_v43 = vpack.c.bf16 %v2061_v31, %v2060_v16  ;;  %3609 = vmatprep.subr.bf16.mxu0 %v3829_v15  ;;  %v2078_v37 = vmul.f32 %v4056_v35, %v5029_v14 }
 0x2f4   : > { %v4058_v17 = vpop.eup %4057  ;;  %4067 = vrcp.f32 %v1931_v60 }
 0x2f5   : > { %3562 = vmatmul.mubr.bf16.gmra.mrb[44].mxu0 %v2181_v43  ;;  %v1933_v25 = vpop.xlane.xlu1 %1932  ;;  %v2079_v0 = vmul.f32 %v4058_v17, %v5035_v4  ;;  %2142 = vst [vmem:[%s5079_s7 + $0x100] sm:$0xff] %v2078_v37 }
 0x2f6   : > { %v4060_v22 = vpop.eup %4059  ;;  %4069 = vrcp.f32 %v1933_v25  ;;  %3610 = vmatpush3.bf16.msra.mxu0 %v3829_v15 }
 0x2f7   : > { %v2080_v56 = vmul.f32 %v4060_v22, %v5042_v3  ;;  %v1935_v30 = vpop.xlane.xlu0 %1934  ;;  %3611 = vmatprep.subr.bf16.mxu0 %v3830_v51  ;;  %2143 = vst [vmem:[%s5079_s7 + $0x108] sm:$0xff] %v2079_v0  ;;  %v2190_v54 = vpack.c.bf16 %v2079_v0, %v2078_v37 }
 0x2f8   : > { %v4062_v33 = vpop.eup %4061  ;;  %4071 = vrcp.f32 %v1935_v30 }
 0x2f9   : > { %2144 = vst [vmem:[%s5079_s7 + $0x110] sm:$0xff] %v2080_v56  ;;  %v2081_v14 = vmul.f32 %v4062_v33, %v5046_v48  ;;  %3613 = vmatprep.mubr.bf16.mxu0 %v2190_v54  ;;  %v1937_v21 = vpop.xlane.xlu1 %1936 }
 0x2fa   : > { %v4064_v4 = vpop.eup %4063  ;;  %4073 = vrcp.f32 %v1937_v21  ;;  %3612 = vmatpush3.bf16.msra.mxu0 %v3830_v51 }
 0x2fb   : > { %2145 = vst [vmem:[%s5079_s7 + $0x118] sm:$0xff] %v2081_v14  ;;  %v1939_v28 = vpop.xlane.xlu0 %1938  ;;  %v2191_v9 = vpack.c.bf16 %v2081_v14, %v2080_v56  ;;  %v2082_v3 = vmul.f32 %v4064_v4, %v5050_v38 }
 0x2fc   : > { %v4066_v5 = vpop.eup %4065  ;;  %4075 = vrcp.f32 %v1939_v28 }
 0x2fd   : > { %3614 = vmatmul.mubr.bf16.vlgmr.msra.gmra.mrb[48].mxu0 %v2191_v9  ;;  %v1941_v2 = vpop.xlane.xlu1 %1940  ;;  %v2083_v63 = vmul.f32 %v4066_v5, %v5055_v45  ;;  %2146 = vst [vmem:[%s5079_s7 + $0x120] sm:$0xff] %v2082_v3 }
 0x2fe   : > { %v4068_v48 = vpop.eup %4067  ;;  %4077 = vrcp.f32 %v1941_v2 }
 0x2ff   : > { %v1943_v49 = vpop.xlane.xlu0 %1942  ;;  %2147 = vst [vmem:[%s5079_s7 + $0x128] sm:$0xff] %v2083_v63  ;;  %v2192_v10 = vpack.c.bf16 %v2083_v63, %v2082_v3  ;;  %v2084_v40 = vmul.f32 %v4068_v48, %v5059_v20 }
 0x300   : > { %v4070_v55 = vpop.eup %4069  ;;  %4079 = vrcp.f32 %v1943_v49 }
 0x301   : > { %3617 = vmatprep.mubr.bf16.mxu0 %v2192_v10  ;;  %v1945_v38 = vpop.xlane.xlu1 %1944  ;;  %v2085_v42 = vmul.f32 %v4070_v55, %v5063_v12  ;;  %2148 = vst [vmem:[%s5079_s7 + $0x130] sm:$0xff] %v2084_v40 }
 0x302   : > { %v4072_v62 = vpop.eup %4071  ;;  %4081 = vrcp.f32 %v1945_v38 }
 0x303   : > { %v1947_v45 = vpop.xlane.xlu0 %1946  ;;  %2149 = vst [vmem:[%s5079_s7 + $0x138] sm:$0xff] %v2085_v42  ;;  %v2193_v13 = vpack.c.bf16 %v2085_v42, %v2084_v40  ;;  %v2086_v34 = vmul.f32 %v4072_v62, %v5068_v7 }
 0x304   : > { %v4074_v23 = vpop.eup %4073  ;;  %4083 = vrcp.f32 %v1947_v45 }
 0x305   : > { %3618 = vmatmul.mubr.bf16.gmra.mrb[52].mxu0 %v2193_v13  ;;  %v1949_v20 = vpop.xlane.xlu1 %1948  ;;  %v2087_v47 = vmul.f32 %v4074_v23, %v5071_v26  ;;  %2150 = vst [vmem:[%s5079_s7 + $0x140] sm:$0xff] %v2086_v34 }
 0x306   : > { %v4076_v1 = vpop.eup %4075  ;;  %4085 = vrcp.f32 %v1949_v20 }
 0x307   : > { %2151 = vst [vmem:[%s5079_s7 + $0x148] sm:$0xff] %v2087_v47  ;;  %v2194_v12 = vpack.c.bf16 %v2087_v47, %v2086_v34  ;;  %v2088_v61 = vmul.f32 %v4076_v1, %v5074_v27 }
 0x308   : > { %v4078_v46 = vpop.eup %4077 }
 0x309   : > { %3621 = vmatprep.mubr.bf16.mxu0 %v2194_v12  ;;  %v2089_v7 = vmul.f32 %v4078_v46, %v5077_v6  ;;  %2152 = vst [vmem:[%s5079_s7 + $0x150] sm:$0xff] %v2088_v61 }
 0x30a   : > { %v4080_v39 = vpop.eup %4079 }
 0x30b   : > { %2153 = vst [vmem:[%s5079_s7 + $0x158] sm:$0xff] %v2089_v7  ;;  %v2195_v24 = vpack.c.bf16 %v2089_v7, %v2088_v61  ;;  %v2090_v26 = vmul.f32 %v4080_v39, %v5086_v53 }
 0x30c   : > { %v4082_v58 = vpop.eup %4081 }
 0x30d   : > { %3622 = vmatmul.mubr.bf16.gmra.mrb[56].mxu0 %v2195_v24  ;;  %v2091_v19 = vmul.f32 %v4082_v58, %v5091_v32  ;;  %2154 = vst [vmem:[%s5079_s7 + $0x160] sm:$0xff] %v2090_v26 }
 0x30e   : > { %v4084_v50 = vpop.eup %4083 }
 0x30f   : > { %2155 = vst [vmem:[%s5079_s7 + $0x168] sm:$0xff] %v2091_v19  ;;  %v2196_v27 = vpack.c.bf16 %v2091_v19, %v2090_v26  ;;  %v2092_v29 = vmul.f32 %v4084_v50, %v5094_v41 }
 0x310   : > { %v4086_v59 = vpop.eup %4085 }
 0x311   : > { %3625 = vmatprep.mubr.bf16.mxu0 %v2196_v27  ;;  %v2093_v6 = vmul.f32 %v4086_v59, %v5100_v57  ;;  %2156 = vst [vmem:[%s5079_s7 + $0x170] sm:$0xff] %v2092_v29 }
 0x313   : > { %2157 = vst [vmem:[%s5079_s7 + $0x178] sm:$0xff] %v2093_v6  ;;  %v2197_v8 = vpack.c.bf16 %v2093_v6, %v2092_v29 }
 0x315   : > { %3626 = vmatmul.mubr.bf16.gmra.mrb[60].mxu0 %v2197_v8 }
 0x34e   : > { %v3583_v11 = vpop.f32.mrb[32].mxu1 }
 0x34f   : > { %2806 = vrot.lane.b32.xlu1 %v3583_v11, %s4151_s8  ;;  %v2433_v53 = vpop.f32.mrb[33].mxu1 }
 0x350   : > { %2802 = vrot.lane.b32.xlu0 %v2433_v53, %s4151_s8  ;;  %v3584_v32 = vpop.f32.mrb[34].mxu1 }
 0x351   : > { %v2436_v18 = vpop.f32.mrb[35].mxu1 }
 0x353   : > { %2808 = vrot.lane.b32.xlu1 %v3584_v32, %s4151_s8 }
 0x357   : > { %2804 = vrot.lane.b32.xlu1 %v2436_v18, %s4151_s8 }
 0x35b   : > { %v3587_v41 = vpop.f32.mrb[36].mxu1 }
 0x35c   : > { %2814 = vrot.lane.b32.xlu0 %v3587_v41, %s4151_s8  ;;  %v2449_v57 = vpop.f32.mrb[37].mxu1 }
 0x35d   : > { %v3588_v44 = vpop.f32.mrb[38].mxu1 }
 0x35e   : > { %2816 = vrot.lane.b32.xlu1 %v3588_v44, %s4151_s8  ;;  %v2452_v16 = vpop.f32.mrb[39].mxu1 }
 0x360   : > { %2810 = vrot.lane.b32.xlu0 %v2449_v57, %s4151_s8 }
 0x362   : > { %2812 = vrot.lane.b32.xlu1 %v2452_v16, %s4151_s8 }
 0x36b   : > { %v3591_v15 = vpop.f32.mrb[40].mxu1 }
 0x36c   : > { %2822 = vrot.lane.b32.xlu0 %v3591_v15, %s4151_s8  ;;  %v2465_v36 = vpop.f32.mrb[41].mxu1 }
 0x36d   : > { %v3592_v52 = vpop.f32.mrb[42].mxu1 }
 0x36e   : > { %2824 = vrot.lane.b32.xlu1 %v3592_v52, %s4151_s8  ;;  %v2468_v31 = vpop.f32.mrb[43].mxu1 }
 0x370   : > { %2818 = vrot.lane.b32.xlu0 %v2465_v36, %s4151_s8 }
 0x372   : > { %2820 = vrot.lane.b32.xlu1 %v2468_v31, %s4151_s8 }
 0x37b   : > { %v3595_v35 = vpop.f32.mrb[44].mxu1 }
 0x37c   : > { %2830 = vrot.lane.b32.xlu0 %v3595_v35, %s4151_s8  ;;  %v2481_v60 = vpop.f32.mrb[45].mxu1 }
 0x37d   : > { %v3596_v43 = vpop.f32.mrb[46].mxu1 }
 0x37e   : > { %2832 = vrot.lane.b32.xlu1 %v3596_v43, %s4151_s8  ;;  %v2484_v51 = vpop.f32.mrb[47].mxu1 }
 0x380   : > { %2826 = vrot.lane.b32.xlu0 %v2481_v60, %s4151_s8 }
 0x382   : > { %2828 = vrot.lane.b32.xlu1 %v2484_v51, %s4151_s8 }
 0x38d   : > { %v3647_v37 = vpop.f32.mrb[48].mxu1 }
 0x38e   : > { %2870 = vrot.lane.b32.xlu0 %v3647_v37, %s4151_s8  ;;  %v2723_v17 = vpop.f32.mrb[49].mxu1 }
 0x38f   : > { %v3648_v25 = vpop.f32.mrb[50].mxu1 }
 0x390   : > { %2872 = vrot.lane.b32.xlu1 %v3648_v25, %s4151_s8  ;;  %v2726_v0 = vpop.f32.mrb[51].mxu1 }
 0x392   : > { %2866 = vrot.lane.b32.xlu0 %v2723_v17, %s4151_s8 }
 0x394   : > { %2868 = vrot.lane.b32.xlu1 %v2726_v0, %s4151_s8 }
 0x399   : > { %v3651_v22 = vpop.f32.mrb[52].mxu1 }
 0x39a   : > { %2878 = vrot.lane.b32.xlu0 %v3651_v22, %s4151_s8  ;;  %v2739_v56 = vpop.f32.mrb[53].mxu1 }
 0x39b   : > { %v3652_v30 = vpop.f32.mrb[54].mxu1 }
 0x39c   : > { %2880 = vrot.lane.b32.xlu1 %v3652_v30, %s4151_s8  ;;  %v2742_v54 = vpop.f32.mrb[55].mxu1 }
 0x39e   : > { %2874 = vrot.lane.b32.xlu0 %v2739_v56, %s4151_s8 }
 0x3a0   : > { %2876 = vrot.lane.b32.xlu1 %v2742_v54, %s4151_s8 }
 0x3a5   : > { %v3655_v33 = vpop.f32.mrb[56].mxu1 }
 0x3a6   : > { %2886 = vrot.lane.b32.xlu0 %v3655_v33, %s4151_s8  ;;  %v2755_v14 = vpop.f32.mrb[57].mxu1 }
 0x3a7   : > { %v3656_v21 = vpop.f32.mrb[58].mxu1 }
 0x3a8   : > { %2888 = vrot.lane.b32.xlu1 %v3656_v21, %s4151_s8  ;;  %v2758_v4 = vpop.f32.mrb[59].mxu1 }
 0x3aa   : > { %2882 = vrot.lane.b32.xlu0 %v2755_v14, %s4151_s8 }
 0x3ac   : > { %2884 = vrot.lane.b32.xlu1 %v2758_v4, %s4151_s8 }
 0x3ad   : > { %v3659_v28 = vpop.f32.mrb[60].mxu1 }
 0x3ae   : > { %4100 = shalt.err (!%p4097_p3)
}
 0x3af   : > { %s4101_s23 = scalar_lea.hbm %s5269_s13, 8192  ;;  %s4105_s30 = scalar_lea.hbm %s5397_s5, 16384 }
 0x3b0   : > { %p4102_p4 = scmp.ne.s32.totalorder %s5269_s13, %s4101_s23  ;;  %p4106_p9 = scmp.lt.u32.totalorder %s5269_s13, %s5397_s5 }
 0x3b1   : > { %p4107_p10 = scmp.lt.u32.totalorder %s4105_s30, %s4101_s23  ;;  %p4109_p12 = scmp.lt.u32.totalorder %s4101_s23, %s5269_s13 }
 0x3b2   : > { %p4103_p7 = pnand %p4102_p4, %p4223_p5 }
 0x3b3   : > { %p4108_p11 = por %p4107_p10, %p4106_p9 }
 0x3b4   : > { %p4104_p8 = pneg %p4103_p7 }
 0x3b5   : > { %p4110_p13 = por %p4109_p12, %p4108_p11 }
 0x3b7   : > { %p4111_p0 = pnand %p4110_p13, %p4104_p8 }
 0x3b9   : > { %4114 = shalt.err (!%p4111_p0)
}
 0x3ba   : > { %s4153_s11 = smov 128   ;;  %s4154_s12 = smov 8   ;;  %v2771_v9 = vpop.f32.mrb[61].mxu1  ;;  %v3551_v5 = vpop.f32.mrb[32].mxu0 }
 0x3bb   : > { %3693 = dma.vmem_to_hbm [thread:$0]  (%p4223_p5), %s5272_s10, 8192, %s5269_s13, %s5277_s14, %s4153_s11, %s4153_s11, %s4154_s12   ;;  %v3660_v3 = vpop.f32.mrb[62].mxu1  ;;  %v2288_v63 = vpop.f32.mrb[33].mxu0 }
 0x3bc   : > { %2890 = vrot.lane.b32.xlu0 %v2771_v9, %s4151_s8  ;;  %v2774_v2 = vpop.f32.mrb[63].mxu1  ;;  %v3552_v48 = vpop.f32.mrb[34].mxu0  ;;  %s5309_s13 = scalar_lea.vmem %s5396_s4, %s4238_s6 }
 0x3bd   : > { %2892 = vrot.lane.b32.xlu1 %v2774_v2, %s4151_s8  ;;  %v2291_v49 = vpop.f32.mrb[35].mxu0 }
 0x3be   : > { %v3555_v10 = vpop.f32.mrb[36].mxu0 }
 0x3bf   : > { %v2304_v40 = vpop.f32.mrb[37].mxu0 }
 0x3c0   : > { %2894 = vrot.lane.b32.xlu0 %v3659_v28, %s4151_s8  ;;  %v3556_v55 = vpop.f32.mrb[38].mxu0 }
 0x3c1   : > { %2896 = vrot.lane.b32.xlu1 %v3660_v3, %s4151_s8  ;;  %v2307_v38 = vpop.f32.mrb[39].mxu0  ;;  %v2807_v45 = vpop.permute.xlu1 %2806 }
 0x3c2   : > { %v3559_v42 = vpop.f32.mrb[40].mxu0  ;;  %v2916_v34 = vsel %vm585_vm0, %v3551_v5, %v2807_v45  ;;  %v2803_v23 = vpop.permute.xlu0 %2802 }
 0x3c3   : > { %v2320_v62 = vpop.f32.mrb[41].mxu0  ;;  %2950 = vst [vmem:[%s5309_s13 + $0x20] sm:$0xff] %v2916_v34  ;;  %v2914_v20 = vsel %vm585_vm0, %v2288_v63, %v2803_v23 }
 0x3c4   : > { %v3560_v13 = vpop.f32.mrb[42].mxu0  ;;  %2946 = vst [vmem:[%s5309_s13] sm:$0xff] %v2914_v20 }
 0x3c5   : > { %v2323_v47 = vpop.f32.mrb[43].mxu0  ;;  %v2809_v1 = vpop.permute.xlu1 %2808 }
 0x3c6   : > { %v2917_v12 = vsel %vm585_vm0, %v3552_v48, %v2809_v1 }
 0x3c7   : > { %2952 = vst [vmem:[%s5309_s13 + $0x30] sm:$0xff] %v2917_v12 }
 0x3c8   : > { %v3563_v61 = vpop.f32.mrb[44].mxu0 }
 0x3c9   : > { %v2336_v46 = vpop.f32.mrb[45].mxu0  ;;  %v2805_v7 = vpop.permute.xlu1 %2804 }
 0x3ca   : > { %v3564_v39 = vpop.f32.mrb[46].mxu0  ;;  %v2915_v24 = vsel %vm585_vm0, %v2291_v49, %v2805_v7 }
 0x3cb   : > { %2948 = vst [vmem:[%s5309_s13 + $0x10] sm:$0xff] %v2915_v24  ;;  %v2339_v26 = vpop.f32.mrb[47].mxu0 }
 0x3ce   : > { %v2815_v58 = vpop.permute.xlu0 %2814 }
 0x3cf   : > { %v2920_v19 = vsel %vm585_vm0, %v3555_v10, %v2815_v58 }
 0x3d0   : > { %2958 = vst [vmem:[%s5309_s13 + $0x60] sm:$0xff] %v2920_v19  ;;  %v3615_v50 = vpop.f32.mrb[48].mxu0  ;;  %v2817_v27 = vpop.permute.xlu1 %2816 }
 0x3d1   : > { %v2921_v29 = vsel %vm585_vm0, %v3556_v55, %v2817_v27  ;;  %v2578_v59 = vpop.f32.mrb[49].mxu0 }
 0x3d2   : > { %2960 = vst [vmem:[%s5309_s13 + $0x70] sm:$0xff] %v2921_v29  ;;  %v2811_v6 = vpop.permute.xlu0 %2810  ;;  %v3616_v8 = vpop.f32.mrb[50].mxu0 }
 0x3d3   : > { %v2918_v11 = vsel %vm585_vm0, %v2304_v40, %v2811_v6  ;;  %v2581_v53 = vpop.f32.mrb[51].mxu0 }
 0x3d4   : > { %2954 = vst [vmem:[%s5309_s13 + $0x40] sm:$0xff] %v2918_v11  ;;  %v2813_v32 = vpop.permute.xlu1 %2812 }
 0x3d5   : > { %v2919_v18 = vsel %vm585_vm0, %v2307_v38, %v2813_v32 }
 0x3d6   : > { %2956 = vst [vmem:[%s5309_s13 + $0x50] sm:$0xff] %v2919_v18 }
 0x3d8   : > { %v3619_v41 = vpop.f32.mrb[52].mxu0 }
 0x3d9   : > { %v2594_v57 = vpop.f32.mrb[53].mxu0 }
 0x3da   : > { %v3620_v44 = vpop.f32.mrb[54].mxu0 }
 0x3db   : > { %v2597_v16 = vpop.f32.mrb[55].mxu0 }
 0x3de   : > { %v2823_v15 = vpop.permute.xlu0 %2822 }
 0x3df   : > { %v2924_v36 = vsel %vm585_vm0, %v3559_v42, %v2823_v15 }
 0x3e0   : > { %2966 = vst [vmem:[%s5309_s13 + $0xa0] sm:$0xff] %v2924_v36  ;;  %v3623_v52 = vpop.f32.mrb[56].mxu0  ;;  %v2825_v31 = vpop.permute.xlu1 %2824 }
 0x3e1   : > { %v2925_v35 = vsel %vm585_vm0, %v3560_v13, %v2825_v31  ;;  %v2610_v60 = vpop.f32.mrb[57].mxu0 }
 0x3e2   : > { %2968 = vst [vmem:[%s5309_s13 + $0xb0] sm:$0xff] %v2925_v35  ;;  %v2819_v43 = vpop.permute.xlu0 %2818  ;;  %v3624_v51 = vpop.f32.mrb[58].mxu0 }
 0x3e3   : > { %v2922_v37 = vsel %vm585_vm0, %v2320_v62, %v2819_v43  ;;  %v2613_v17 = vpop.f32.mrb[59].mxu0 }
 0x3e4   : > { %2962 = vst [vmem:[%s5309_s13 + $0x80] sm:$0xff] %v2922_v37  ;;  %v2821_v25 = vpop.permute.xlu1 %2820 }
 0x3e5   : > { %v2923_v0 = vsel %vm585_vm0, %v2323_v47, %v2821_v25 }
 0x3e6   : > { %2964 = vst [vmem:[%s5309_s13 + $0x90] sm:$0xff] %v2923_v0 }
 0x3e8   : > { %v3627_v22 = vpop.f32.mrb[60].mxu0 }
 0x3e9   : > { %v2626_v56 = vpop.f32.mrb[61].mxu0 }
 0x3ea   : > { %v3628_v30 = vpop.f32.mrb[62].mxu0 }
 0x3eb   : > { %v2629_v54 = vpop.f32.mrb[63].mxu0 }
 0x3ee   : > { %v2831_v33 = vpop.permute.xlu0 %2830 }
 0x3ef   : > { %v2928_v14 = vsel %vm585_vm0, %v3563_v61, %v2831_v33 }
 0x3f0   : > { %2974 = vst [vmem:[%s5309_s13 + $0xe0] sm:$0xff] %v2928_v14  ;;  %v2833_v21 = vpop.permute.xlu1 %2832 }
 0x3f1   : > { %v2929_v4 = vsel %vm585_vm0, %v3564_v39, %v2833_v21 }
 0x3f2   : > { %2976 = vst [vmem:[%s5309_s13 + $0xf0] sm:$0xff] %v2929_v4  ;;  %v2827_v28 = vpop.permute.xlu0 %2826 }
 0x3f3   : > { %v2926_v9 = vsel %vm585_vm0, %v2336_v46, %v2827_v28 }
 0x3f4   : > { %2970 = vst [vmem:[%s5309_s13 + $0xc0] sm:$0xff] %v2926_v9  ;;  %v2829_v3 = vpop.permute.xlu1 %2828 }
 0x3f5   : > { %v2927_v5 = vsel %vm585_vm0, %v2339_v26, %v2829_v3 }
 0x3f6   : > { %2972 = vst [vmem:[%s5309_s13 + $0xd0] sm:$0xff] %v2927_v5 }
 0x400   : > { %v2871_v2 = vpop.permute.xlu0 %2870 }
 0x401   : > { %v2932_v63 = vsel %vm585_vm0, %v3615_v50, %v2871_v2 }
 0x402   : > { %2951 = vst [vmem:[%s5309_s13 + $0x28] sm:$0xff] %v2932_v63  ;;  %v2873_v48 = vpop.permute.xlu1 %2872 }
 0x403   : > { %v2933_v49 = vsel %vm585_vm0, %v3616_v8, %v2873_v48 }
 0x404   : > { %2953 = vst [vmem:[%s5309_s13 + $0x38] sm:$0xff] %v2933_v49  ;;  %v2867_v10 = vpop.permute.xlu0 %2866 }
 0x405   : > { %v2930_v40 = vsel %vm585_vm0, %v2578_v59, %v2867_v10 }
 0x406   : > { %2947 = vst [vmem:[%s5309_s13 + $0x8] sm:$0xff] %v2930_v40  ;;  %v2869_v55 = vpop.permute.xlu1 %2868 }
 0x407   : > { %v2931_v38 = vsel %vm585_vm0, %v2581_v53, %v2869_v55 }
 0x408   : > { %2949 = vst [vmem:[%s5309_s13 + $0x18] sm:$0xff] %v2931_v38 }
 0x40c   : > { %v2879_v42 = vpop.permute.xlu0 %2878 }
 0x40d   : > { %v2936_v62 = vsel %vm585_vm0, %v3619_v41, %v2879_v42 }
 0x40e   : > { %2959 = vst [vmem:[%s5309_s13 + $0x68] sm:$0xff] %v2936_v62  ;;  %v2881_v45 = vpop.permute.xlu1 %2880 }
 0x40f   : > { %v2937_v13 = vsel %vm585_vm0, %v3620_v44, %v2881_v45 }
 0x410   : > { %2961 = vst [vmem:[%s5309_s13 + $0x78] sm:$0xff] %v2937_v13  ;;  %v2875_v34 = vpop.permute.xlu0 %2874 }
 0x411   : > { %v2934_v23 = vsel %vm585_vm0, %v2594_v57, %v2875_v34 }
 0x412   : > { %2955 = vst [vmem:[%s5309_s13 + $0x48] sm:$0xff] %v2934_v23  ;;  %v2877_v20 = vpop.permute.xlu1 %2876 }
 0x413   : > { %v2935_v47 = vsel %vm585_vm0, %v2597_v16, %v2877_v20 }
 0x414   : > { %2957 = vst [vmem:[%s5309_s13 + $0x58] sm:$0xff] %v2935_v47 }
 0x418   : > { %v2887_v1 = vpop.permute.xlu0 %2886 }
 0x419   : > { %v2940_v12 = vsel %vm585_vm0, %v3623_v52, %v2887_v1 }
 0x41a   : > { %2967 = vst [vmem:[%s5309_s13 + $0xa8] sm:$0xff] %v2940_v12  ;;  %v2889_v61 = vpop.permute.xlu1 %2888 }
 0x41b   : > { %v2941_v46 = vsel %vm585_vm0, %v3624_v51, %v2889_v61 }
 0x41c   : > { %2969 = vst [vmem:[%s5309_s13 + $0xb8] sm:$0xff] %v2941_v46  ;;  %v2883_v7 = vpop.permute.xlu0 %2882 }
 0x41d   : > { %v2938_v39 = vsel %vm585_vm0, %v2610_v60, %v2883_v7 }
 0x41e   : > { %2963 = vst [vmem:[%s5309_s13 + $0x88] sm:$0xff] %v2938_v39  ;;  %v2885_v24 = vpop.permute.xlu1 %2884 }
 0x41f   : > { %v2939_v26 = vsel %vm585_vm0, %v2613_v17, %v2885_v24 }
 0x420   : > { %2965 = vst [vmem:[%s5309_s13 + $0x98] sm:$0xff] %v2939_v26 }
 0x42e   : > { %v2891_v58 = vpop.permute.xlu0 %2890 }
 0x42f   : > { %v2942_v19 = vsel %vm585_vm0, %v2626_v56, %v2891_v58  ;;  %v2893_v50 = vpop.permute.xlu1 %2892 }
 0x430   : > { %2971 = vst [vmem:[%s5309_s13 + $0xc8] sm:$0xff] %v2942_v19  ;;  %v2943_v27 = vsel %vm585_vm0, %v2629_v54, %v2893_v50 }
 0x431   : > { %2973 = vst [vmem:[%s5309_s13 + $0xd8] sm:$0xff] %v2943_v27 }
 0x432   : > { %v2895_v29 = vpop.permute.xlu0 %2894 }
 0x433   : > { %v2944_v59 = vsel %vm585_vm0, %v3627_v22, %v2895_v29  ;;  %v2897_v6 = vpop.permute.xlu1 %2896 }
 0x434   : > { %2975 = vst [vmem:[%s5309_s13 + $0xe8] sm:$0xff] %v2944_v59  ;;  %v2945_v8 = vsel %vm585_vm0, %v3628_v30, %v2897_v6 }
 0x435   : > { %2977 = vst [vmem:[%s5309_s13 + $0xf8] sm:$0xff] %v2945_v8 }
 0x436 PF: > { %p3699_p5 = scmp.ge.s32.totalorder %s4149_s21, 2  ;;  %s3023_s6 = sand.u32 1, %s4137_s18  }
 0x437   : > { %s3024_s8 = scalar_lea.sflag [#allocation3], %s3023_s6 }
 0x438   : > { %p3696_p1 = pnand %p3699_p5, %p4227_p6 }
 0x43a   : > { %4132 = dma.done.wait (!%p3696_p1), %s3024_s8, 8192  }
 0x43b   : > { %4134 = vsyncadd (!%p3696_p1), %s3024_s8, 4294959104  ;;  %p16_p2 = scmp.ge.s32.totalorder %s4210_s24, 4   ;;  %s5493_s18 = smov %s4141_s19 }
 0x43c   : > { %s5494_s19 = smov %s4145_s20  ;;  %s5495_s20 = smov %s4221_s27 }
 0x43d   : > { %s5496_s21 = smov %s4210_s24  ;;  %18 = sbr.rel (!%p16_p2) target bundleno = 3 (0x3), region = 92 }
 0x444   :  { %3029 = vsyncpa [#allocation3], 1 }
 0x445   :  { %3031 = vsyncpa [#allocation3 + $0x1], 1 }

</bundles_post_ra>
